<compile_context>
chip_gen: v7x
topology: tpu7x:2x2x1
jax: 0.10.0
libtpu: 0.0.40
codegen_flags: <defaults>
</compile_context>

<pallas_src>
import functools

import jax
import jax.numpy as jnp
from jax.experimental import pallas as pl
from jax.experimental.pallas import tpu as pltpu


# ----------------------------------------------------------------------------
# Pallas kernel: nearest-code search (argmin over squared L2 distances).
# ----------------------------------------------------------------------------
def _vq_argmin_kernel(x_ref, ct_ref, e2_ref, idx_ref, bmin_sc, barg_sc):
    # x_ref   : (TN, E)        input rows
    # ct_ref  : (E, TC)        codebook tile, transposed
    # e2_ref  : (1, TC)        per-code squared norms
    # idx_ref : (TN, 1) int32  output (written at last code tile)
    # bmin_sc : (TN, 1) f32    running minimum distance (VMEM scratch)
    # barg_sc : (TN, 1) int32  running argmin            (VMEM scratch)
    c = pl.program_id(1)
    nc = pl.num_programs(1)
    tc = ct_ref.shape[1]

    @pl.when(c == 0)
    def _():
        bmin_sc[...] = jnp.full(bmin_sc.shape, jnp.inf, bmin_sc.dtype)
        barg_sc[...] = jnp.zeros(barg_sc.shape, barg_sc.dtype)

    x = x_ref[...]                                          # (TN, E)
    # squared distance minus the row-constant ||x||^2 term (argmin-invariant)
    d = e2_ref[...] - 2.0 * jnp.dot(x, ct_ref[...],
                                    preferred_element_type=jnp.float32)  # (TN, TC)

    local_min = jnp.min(d, axis=1, keepdims=True)           # (TN, 1)
    ids = jax.lax.broadcasted_iota(jnp.int32, d.shape, 1)   # (TN, TC)
    big = jnp.int32(2 ** 30)
    # first occurrence of the minimum within this code tile
    local_arg = jnp.min(jnp.where(d == local_min, ids, big),
                        axis=1, keepdims=True) + c * tc     # (TN, 1)

    better = local_min < bmin_sc[...]                       # strict < keeps first tile on ties
    barg_sc[...] = jnp.where(better, local_arg, barg_sc[...])
    bmin_sc[...] = jnp.minimum(local_min, bmin_sc[...])

    @pl.when(c == nc - 1)
    def _():
        idx_ref[...] = barg_sc[...]


def _pick_tile(n, candidates):
    for t in candidates:
        if t <= n and n % t == 0:
            return t
    return n  # fall back to the full dimension (always a legal block)


def vq_nearest_code(flat_x, codebook):
    """flat_x: (N, E) f32; codebook: (n_codes, E) f32 -> (N,) int32 indices."""
    n, e = flat_x.shape
    n_codes = codebook.shape[0]
    ct = codebook.T                                          # (E, n_codes)
    e2 = jnp.sum(codebook * codebook, axis=1).reshape(1, n_codes)

    tn = _pick_tile(n, (256, 128, 64, 32, 16, 8))            # rows per step (MXU M)
    tc = _pick_tile(n_codes, (256, 128))                     # codes per step (MXU N)
    grid = (n // tn, n_codes // tc)                          # reduction axis last

    idx = pl.pallas_call(
        _vq_argmin_kernel,
        out_shape=jax.ShapeDtypeStruct((n, 1), jnp.int32),
        grid=grid,
        in_specs=[
            pl.BlockSpec((tn, e), lambda i, c: (i, 0)),
            pl.BlockSpec((e, tc), lambda i, c: (0, c)),
            pl.BlockSpec((1, tc), lambda i, c: (0, c)),
        ],
        out_specs=pl.BlockSpec((tn, 1), lambda i, c: (i, 0)),
        scratch_shapes=[pltpu.VMEM((tn, 1), jnp.float32),
                        pltpu.VMEM((tn, 1), jnp.int32)],
        compiler_params=pltpu.CompilerParams(
            dimension_semantics=("parallel", "arbitrary")),
    )(flat_x, ct, e2)
    return idx.reshape(n)


# ----------------------------------------------------------------------------
# Full Codebook forward (eval mode).  Glue in plain JAX.
# ----------------------------------------------------------------------------
@jax.jit
def codebook_forward(z, embeddings):
    """z: (B, E, D, H, W) f32; embeddings: (n_codes, E) f32 -> dict (as PyTorch)."""
    n_codes, _ = embeddings.shape
    b = z.shape[0]
    spatial = z.shape[2:]

    # faithful to the reference: z.view(-1, z.shape[1]) — a row-major memory
    # reinterpretation (NOT a channels-last permute), reproduced exactly.
    flat_inputs = z.reshape(-1, z.shape[1])                  # (N, E)
    n_flat = flat_inputs.shape[0]

    idx = vq_nearest_code(flat_inputs, embeddings)           # (N,) int32
    encoding_indices = idx.reshape((b,) + spatial)           # (B, D, H, W)

    emb = jnp.take(embeddings, encoding_indices, axis=0)     # (B, D, H, W, E)
    emb = jnp.transpose(emb, (0, 4, 1, 2, 3))                # (B, E, D, H, W)

    commitment_loss = 0.25 * jnp.mean((z - jax.lax.stop_gradient(emb)) ** 2)
    embeddings_st = jax.lax.stop_gradient(emb - z) + z       # straight-through

    counts = jnp.zeros((n_codes,), jnp.float32).at[idx].add(1.0)
    avg_probs = counts / n_flat                              # mean of the one-hot
    perplexity = jnp.exp(-jnp.sum(avg_probs * jnp.log(avg_probs + 1e-10)))

    return dict(embeddings=embeddings_st,
                encodings=encoding_indices,
                commitment_loss=commitment_loss,
                perplexity=perplexity)


if __name__ == "__main__":
    key = jax.random.PRNGKey(0)
    k_emb, k_z = jax.random.split(key)

    n_codes, embedding_dim = 512, 64
    B, D, H, W = 2, 4, 8, 8
    embeddings = jax.random.normal(k_emb, (n_codes, embedding_dim), jnp.float32)
    z = jax.random.normal(k_z, (B, embedding_dim, D, H, W), jnp.float32)

    out = codebook_forward(z, embeddings)
    out = jax.block_until_ready(out)

    # pure-JAX reference for the nearest-code search
    flat = z.reshape(-1, embedding_dim)
    d_ref = (jnp.sum(flat * flat, axis=1, keepdims=True)
             - 2.0 * flat @ embeddings.T
             + jnp.sum(embeddings * embeddings, axis=1)[None, :])
    idx_ref = jnp.argmin(d_ref, axis=1).astype(jnp.int32)
    emb_ref = jnp.transpose(
        jnp.take(embeddings, idx_ref.reshape(B, D, H, W), axis=0), (0, 4, 1, 2, 3))

    assert out["embeddings"].shape == (B, embedding_dim, D, H, W)
    assert out["encodings"].shape == (B, D, H, W)
    assert bool(jnp.all(out["encodings"].reshape(-1) == idx_ref))
    assert bool(jnp.allclose(out["embeddings"], emb_ref, atol=1e-5, rtol=1e-5))
    assert bool(jnp.isfinite(out["commitment_loss"])) and float(out["commitment_loss"]) >= 0.0
    p = float(out["perplexity"])
    assert jnp.isfinite(p) and 1.0 <= p <= n_codes + 1e-3

    print("KERNEL_OK")
</pallas_src>

<mosaic_0001>
module attributes {stable_mosaic.version = 11 : i64} {
  func.func private @main(%arg0: i32) attributes {dimension_semantics = [#tpu.dimension_semantics<core_parallel>], iteration_bounds = array<i64: 2>, tpu.core_type = #tpu.core_type<sc_scalar_subcore>, window_params = []} {
    return
  }
}

module attributes {stable_mosaic.version = 11 : i64} {
  func.func private @main(%arg0: i32) attributes {dimension_semantics = [#tpu.dimension_semantics<core_parallel>], iteration_bounds = array<i64: 2>, tpu.core_type = #tpu.core_type<sc_scalar_subcore>, window_params = []} {
    return
  }
}

module attributes {stable_mosaic.version = 11 : i64} {
  func.func @_vq_argmin_kernel(%arg0: i32, %arg1: i32, %arg2: memref<256x64xf32, #tpu.memory_space<vmem>>, %arg3: memref<64x256xf32, #tpu.memory_space<vmem>>, %arg4: memref<1x256xf32, #tpu.memory_space<vmem>>, %arg5: memref<256x1xi32, #tpu.memory_space<vmem>>, %arg6: memref<256x1xf32, #tpu.memory_space<vmem>>, %arg7: memref<256x1xi32, #tpu.memory_space<vmem>>) attributes {dimension_semantics = [#tpu.dimension_semantics<parallel>, #tpu.dimension_semantics<arbitrary>], iteration_bounds = array<i64: 2, 2>, scalar_prefetch = 0 : i64, scratch_operands = 2 : i64, tpu.core_type = #tpu.core_type<tc>, window_params = [{transform_indices = @transform_0, window_bounds = array<i64: 256, 64>}, {transform_indices = @transform_1, window_bounds = array<i64: 64, 256>}, {transform_indices = @transform_2, window_bounds = array<i64: 1, 256>}, {transform_indices = @transform_3, window_bounds = array<i64: 256, 1>}]} {
    %c0_i32 = arith.constant 0 : i32
    %0 = arith.cmpi eq, %arg1, %c0_i32 : i32
    %1 = arith.extui %0 : i1 to i32
    %c0_i32_0 = arith.constant 0 : i32
    %2 = arith.cmpi ne, %1, %c0_i32_0 : i32
    scf.if %2 {
      %cst_20 = arith.constant 0x7F800000 : f32
      %34 = vector.broadcast %cst_20 : f32 to vector<256x1xf32>
      %c0_21 = arith.constant 0 : index
      %c0_22 = arith.constant 0 : index
      %35 = vector.load %arg6[%c0_21, %c0_22] : memref<256x1xf32, #tpu.memory_space<vmem>>, vector<256x1xf32>
      tpu.vector_store %arg6[%c0_21, %c0_22], %34 {strides = array<i32>} : memref<256x1xf32, #tpu.memory_space<vmem>>, vector<256x1xf32>,
      %c0_i32_23 = arith.constant 0 : i32
      %36 = vector.broadcast %c0_i32_23 : i32 to vector<256x1xi32>
      %c0_24 = arith.constant 0 : index
      %c0_25 = arith.constant 0 : index
      %37 = vector.load %arg7[%c0_24, %c0_25] : memref<256x1xi32, #tpu.memory_space<vmem>>, vector<256x1xi32>
      tpu.vector_store %arg7[%c0_24, %c0_25], %36 {strides = array<i32>} : memref<256x1xi32, #tpu.memory_space<vmem>>, vector<256x1xi32>,
    } else {
    }
    %c0 = arith.constant 0 : index
    %c0_1 = arith.constant 0 : index
    %3 = vector.load %arg2[%c0, %c0_1] : memref<256x64xf32, #tpu.memory_space<vmem>>, vector<256x64xf32>
    %c0_2 = arith.constant 0 : index
    %c0_3 = arith.constant 0 : index
    %4 = vector.load %arg4[%c0_2, %c0_3] : memref<1x256xf32, #tpu.memory_space<vmem>>, vector<1x256xf32>
    %c0_4 = arith.constant 0 : index
    %c0_5 = arith.constant 0 : index
    %5 = vector.load %arg3[%c0_4, %c0_5] : memref<64x256xf32, #tpu.memory_space<vmem>>, vector<64x256xf32>
    %cst = arith.constant dense<0.000000e+00> : vector<256x256xf32>
    %6 = tpu.matmul %3, %5, %cst {dimension_numbers = #tpu.dot_dimension_numbers<[1], [0], [0], [1], [0, 0, 1, 1], [], []>} : vector<256x64xf32>, vector<64x256xf32>, vector<256x256xf32> -> vector<256x256xf32>
    %cst_6 = arith.constant 2.000000e+00 : f32
    %7 = vector.broadcast %cst_6 : f32 to vector<256x256xf32>
    %8 = arith.mulf %7, %6 : vector<256x256xf32>
    %9 = vector.broadcast %4 : vector<1x256xf32> to vector<256x256xf32>
    %10 = arith.subf %9, %8 : vector<256x256xf32>
    %cst_7 = arith.constant dense<0x7F800000> : vector<256xf32>
    %11 = vector.multi_reduction <minimumf>, %10, %cst_7 [1] : vector<256x256xf32> to vector<256xf32>
    %12 = vector.shape_cast %11 : vector<256xf32> to vector<256x1xf32>
    %13 = tpu.iota {dimensions = array<i32: 1>} : vector<256x256xi32>
    %14 = vector.broadcast %12 : vector<256x1xf32> to vector<256x256xf32>
    %15 = arith.cmpf oeq, %10, %14 : vector<256x256xf32>
    %c1073741824_i32 = arith.constant 1073741824 : i32
    %16 = vector.broadcast %c1073741824_i32 : i32 to vector<256x256xi32>
    %17 = arith.select %15, %13, %16 : vector<256x256xi1>, vector<256x256xi32>
    %cst_8 = arith.constant dense<2147483647> : vector<256xi32>
    %18 = vector.multi_reduction <minsi>, %17, %cst_8 [1] : vector<256x256xi32> to vector<256xi32>
    %19 = vector.shape_cast %18 : vector<256xi32> to vector<256x1xi32>
    %c256_i32 = arith.constant 256 : i32
    %20 = arith.muli %arg1, %c256_i32 : i32
    %21 = vector.broadcast %20 : i32 to vector<256x1xi32>
    %22 = arith.addi %19, %21 : vector<256x1xi32>
    %c0_9 = arith.constant 0 : index
    %c0_10 = arith.constant 0 : index
    %23 = vector.load %arg6[%c0_9, %c0_10] : memref<256x1xf32, #tpu.memory_space<vmem>>, vector<256x1xf32>
    %24 = arith.cmpf olt, %12, %23 : vector<256x1xf32>
    %c0_11 = arith.constant 0 : index
    %c0_12 = arith.constant 0 : index
    %25 = vector.load %arg7[%c0_11, %c0_12] : memref<256x1xi32, #tpu.memory_space<vmem>>, vector<256x1xi32>
    %26 = arith.select %24, %22, %25 : vector<256x1xi1>, vector<256x1xi32>
    %c0_13 = arith.constant 0 : index
    %c0_14 = arith.constant 0 : index
    %27 = vector.load %arg7[%c0_13, %c0_14] : memref<256x1xi32, #tpu.memory_space<vmem>>, vector<256x1xi32>
    tpu.vector_store %arg7[%c0_13, %c0_14], %26 {strides = array<i32>} : memref<256x1xi32, #tpu.memory_space<vmem>>, vector<256x1xi32>,
    %c0_15 = arith.constant 0 : index
    %c0_16 = arith.constant 0 : index
    %28 = vector.load %arg6[%c0_15, %c0_16] : memref<256x1xf32, #tpu.memory_space<vmem>>, vector<256x1xf32>
    %29 = arith.minimumf %12, %28 : vector<256x1xf32>
    %c0_17 = arith.constant 0 : index
    %c0_18 = arith.constant 0 : index
    %30 = vector.load %arg6[%c0_17, %c0_18] : memref<256x1xf32, #tpu.memory_space<vmem>>, vector<256x1xf32>
    tpu.vector_store %arg6[%c0_17, %c0_18], %29 {strides = array<i32>} : memref<256x1xf32, #tpu.memory_space<vmem>>, vector<256x1xf32>,
    %c1_i32 = arith.constant 1 : i32
    %31 = arith.cmpi eq, %arg1, %c1_i32 : i32
    %32 = arith.extui %31 : i1 to i32
    %c0_i32_19 = arith.constant 0 : i32
    %33 = arith.cmpi ne, %32, %c0_i32_19 : i32
    scf.if %33 {
      %c0_20 = arith.constant 0 : index
      %c0_21 = arith.constant 0 : index
      %34 = vector.load %arg7[%c0_20, %c0_21] : memref<256x1xi32, #tpu.memory_space<vmem>>, vector<256x1xi32>
      %c0_22 = arith.constant 0 : index
      %c0_23 = arith.constant 0 : index
      %35 = vector.load %arg5[%c0_22, %c0_23] : memref<256x1xi32, #tpu.memory_space<vmem>>, vector<256x1xi32>
      tpu.vector_store %arg5[%c0_22, %c0_23], %34 {strides = array<i32>} : memref<256x1xi32, #tpu.memory_space<vmem>>, vector<256x1xi32>,
    } else {
    }
    return
  }
  func.func @transform_0(%arg0: i32, %arg1: i32) -> (i32, i32) {
    %c0_i32 = arith.constant 0 : i32
    %c0_i32_0 = arith.constant 0 : i32
    return %arg0, %c0_i32 : i32, i32
  }
  func.func @transform_1(%arg0: i32, %arg1: i32) -> (i32, i32) {
    %c0_i32 = arith.constant 0 : i32
    %c0_i32_0 = arith.constant 0 : i32
    return %c0_i32, %arg1 : i32, i32
  }
  func.func @transform_2(%arg0: i32, %arg1: i32) -> (i32, i32) {
    %c0_i32 = arith.constant 0 : i32
    %c0_i32_0 = arith.constant 0 : i32
    return %c0_i32, %arg1 : i32, i32
  }
  func.func @transform_3(%arg0: i32, %arg1: i32) -> (i32, i32) {
    %c0_i32 = arith.constant 0 : i32
    %c0_i32_0 = arith.constant 0 : i32
    return %arg0, %c0_i32 : i32, i32
  }
}

</mosaic_0001>

<bundles_post_ra>
// kernel: codebook_forward.1
= control target key start
LH: loop header
LB: loop body
LE: loop exit
PB: predicated region body
PF: predicated region fallthrough
CT: control target
= control target key end

     0   :  { %s2294_s12 = smov 0   ;;  %s2296_s13 = smov 0   ;;  %s4119_s0 = inlined_call_operand.vmem [shape: f32[512,64], index: 0, kind: input, shape index: {}]   ;;  %s4120_s1 = inlined_call_operand.vmem [shape: f32[64,512], index: 1, kind: input, shape index: {}]   ;;  %s4121_s2 = inlined_call_operand.vmem [shape: f32[1,512], index: 2, kind: input, shape index: {}]   ;;  %s4122_s3 = inlined_call_operand.vmem [shape: s32[512,1], index: 3, kind: output, shape index: {}]  }
   0x1   :  { %s2298_s14 = smov 0   ;;  %s2300_s15 = smov 0  }
   0x2   :  { %s2302_s16 = smov 0   ;;  %s2304_s17 = smov 0  }
   0x3   :  { %s2306_s18 = smov 0  }
   0x4 LB: > { %s22_s19 = sadd.s32 1, %s2261_s16  ;;  %s25_s20 = sadd.s32 1, %s2265_s17  ;;  %s2269_s18 = sphi %s2306_s18, %s13_s18   ;;  %s2265_s17 = sphi %s2304_s17, %s4440_s17   ;;  %s2261_s16 = sphi %s2302_s16, %s4439_s16   ;;  %s2257_s15 = sphi %s2300_s15, %s4438_s15   ;;  %s2253_s14 = sphi %s2298_s14, %s4437_s14   ;;  %s2249_s13 = sphi %s2296_s13, %s4436_s13   ;;  %s2245_s12 = sphi %s2294_s12, %s4435_s12  }
   0x5   : > { %p23_p0 = scmp.ge.s32.totalorder %s22_s19, 2  ;;  %s58_s21 = sadd.s32 1, %s2249_s13 }
   0x6   : > { %p65_p1 = scmp.ne.s32.totalorder %s2249_s13, %s2245_s12  ;;  %p66_p2 = scmp.eq.s32.totalorder %s2269_s18, 0 }
   0x7   : > { %s4442_s19 = smov (%p23_p0, %s22_s19), 0  ;;  %s4444_s20 = smov (!%p23_p0, %s25_s20), %s2265_s17 }
   0x8   : > { %s55_s22 = ssub.s32 %s2261_s16, %s4442_s19  ;;  %p67_p3 = por %p66_p2, %p65_p1 }
   0x9   : > { %p27_p4 = scmp.ge.s32.totalorder %s4444_s20, 2  ;;  %p56_p5 = scmp.eq.s32.totalorder %s55_s22, 0 }
   0xa   : > { %p2083_p6 = scmp.ge.s32.totalorder %s2269_s18, 4 }
   0xb   : > { %s4446_s20 = smov (%p27_p4, %s4444_s20), 0 }
   0xc   : > { %s2343_s23 = scalar_select %p56_p5, %s2249_s13, %s58_s21  }
   0xd   : > { %143 = sbr.rel (%p2083_p6) target bundleno = 32 (0x20), region = 16 }
  0x14   : > { %155 = sbr.rel (!%p67_p3) target bundleno = 32 (0x20), region = 24  ;;  %s157_s24 = sand.u32 (%p67_p3), 1, %s2249_s13  }
  0x15   : > { %s2131_s25 = sshll.u32 (%p67_p3), %s2261_s16, 4  ;;  %s2084_s26 = sshll.u32 (%p67_p3), %s157_s24, 7 }
  0x16   : > { %s2351_s29 = scalar_lea.vmem (%p67_p3), %s4120_s1, %s2131_s25  ;;  %s159_s30 = scalar_lea.vmem (%p67_p3), [#allocation4], %s2084_s26 }
  0x17   : > { %v175_v0 = vld [vmem:[%s2351_s29] sm:$0xff] (%p67_p3)  ;;  %v177_v1 = vld [vmem:[%s2351_s29 + $0x8] sm:$0xff] (%p67_p3) }
  0x18   : > { %v179_v2 = vld [vmem:[%s2351_s29 + $0x20] sm:$0xff] (%p67_p3)  ;;  %176 = vst [vmem:[%s159_s30] sm:$0xff] (%p67_p3), %v175_v0  ;;  %178 = vst [vmem:[%s159_s30 + $0x8] sm:$0xff] (%p67_p3), %v177_v1  ;;  %v181_v3 = vld [vmem:[%s2351_s29 + $0x28] sm:$0xff] (%p67_p3) }
  0x19   : > { %180 = vst [vmem:[%s159_s30 + $0x10] sm:$0xff] (%p67_p3), %v179_v2  ;;  %v183_v4 = vld [vmem:[%s2351_s29 + $0x40] sm:$0xff] (%p67_p3)  ;;  %v185_v5 = vld [vmem:[%s2351_s29 + $0x48] sm:$0xff] (%p67_p3)  ;;  %182 = vst [vmem:[%s159_s30 + $0x18] sm:$0xff] (%p67_p3), %v181_v3 }
  0x1a   : > { %184 = vst [vmem:[%s159_s30 + $0x20] sm:$0xff] (%p67_p3), %v183_v4  ;;  %186 = vst [vmem:[%s159_s30 + $0x28] sm:$0xff] (%p67_p3), %v185_v5  ;;  %v187_v6 = vld [vmem:[%s2351_s29 + $0x60] sm:$0xff] (%p67_p3)  ;;  %v189_v7 = vld [vmem:[%s2351_s29 + $0x68] sm:$0xff] (%p67_p3) }
  0x1b   : > { %v191_v8 = vld [vmem:[%s2351_s29 + $0x80] sm:$0xff]  ;;  %188 = vst [vmem:[%s159_s30 + $0x30] sm:$0xff] %v187_v6  ;;  %190 = vst [vmem:[%s159_s30 + $0x38] sm:$0xff] %v189_v7  ;;  %v193_v9 = vld [vmem:[%s2351_s29 + $0x88] sm:$0xff] }
  0x1c   : > { %192 = vst [vmem:[%s159_s30 + $0x40] sm:$0xff] %v191_v8  ;;  %v195_v10 = vld [vmem:[%s2351_s29 + $0xa0] sm:$0xff]  ;;  %v197_v11 = vld [vmem:[%s2351_s29 + $0xa8] sm:$0xff]  ;;  %194 = vst [vmem:[%s159_s30 + $0x48] sm:$0xff] %v193_v9 }
  0x1d   : > { %196 = vst [vmem:[%s159_s30 + $0x50] sm:$0xff] %v195_v10  ;;  %198 = vst [vmem:[%s159_s30 + $0x58] sm:$0xff] %v197_v11  ;;  %v199_v12 = vld [vmem:[%s2351_s29 + $0xc0] sm:$0xff]  ;;  %v201_v13 = vld [vmem:[%s2351_s29 + $0xc8] sm:$0xff] }
  0x1e   : > { %v203_v14 = vld [vmem:[%s2351_s29 + $0xe0] sm:$0xff]  ;;  %200 = vst [vmem:[%s159_s30 + $0x60] sm:$0xff] %v199_v12  ;;  %202 = vst [vmem:[%s159_s30 + $0x68] sm:$0xff] %v201_v13  ;;  %v205_v15 = vld [vmem:[%s2351_s29 + $0xe8] sm:$0xff] }
  0x1f   : > { %204 = vst [vmem:[%s159_s30 + $0x70] sm:$0xff] %v203_v14  ;;  %206 = vst [vmem:[%s159_s30 + $0x78] sm:$0xff] %v205_v15 }
  0x20 PF: > { %p2087_p7 = scmp.ge.s32.totalorder %s2269_s18, 1  ;;  %p219_p8 = scmp.lt.s32.totalorder %s2269_s18, 5 }
  0x22   : > { %p220_p9 = pnand %p2087_p7, %p219_p8 }
  0x24   : > { %223 = sbr.rel (%p220_p9) target bundleno = 853 (0x355), region = 51 }
  0x2b   : > { %s226_s4 = sand.u32 1, %s2245_s12   ;;  %s2089_s5 = sshll.u32 %s2257_s15, 5 }
  0x2c   : > { %s2088_s6 = sshll.u32 %s226_s4, 7  ;;  %p259_p10 = scmp.lt.s32.totalorder %s2089_s5, 63 }
  0x2d   : > { %s2091_s7 = sshll.u32 %s2253_s14, 1  ;;  %s2390_s26 = scalar_lea.vmem [#allocation4], %s2088_s6 }
  0x2e   : > { %s4448_s5 = smov (!%p259_p10, %s2089_s5), 63  ;;  %p266_p11 = scmp.lt.s32.totalorder %s2091_s7, 3 }
  0x2f   : > { %s2090_s8 = sshll.u32 %s4448_s5, 3  ;;  %p2094_p12 = scmp.ne.s32.totalorder %s2253_s14, 0 }
  0x30   : > { %s2377_s11 = scalar_lea.vmem %s4119_s0, %s2090_s8  ;;  %s2382_s24 = scalar_lea.vmem %s4122_s3, %s2090_s8  ;;  %vm280_vm0 = vcmask (!%p2094_p12), 7168   ;;  %v2271_v16 = vmov (!%p2094_p12), inf   ;;  %v2272_v17 = vmov (!%p2094_p12), 0  }
  0x31   : > { %s4450_s7 = smov (!%p266_p11, %s2091_s7), 3  ;;  %279 = sbr.rel (%p2094_p12) target bundleno = 82 (0x52), region = 59 }
  0x32   : > { %s268_s25 = scalar_lea.vmem %s4121_s2, %s4450_s7  ;;  %281 = vst.msk [vmem:[#allocation2] sm:$0xff] (!%p2094_p12), %vm280_vm0, %v2271_v16  ;;  %282 = vst.msk [vmem:[#allocation2 + $0x8] sm:$0xff] (!%p2094_p12), %vm280_vm0, %v2271_v16 }
  0x33   : > { %283 = vst.msk [vmem:[#allocation2 + $0x10] sm:$0xff] (!%p2094_p12), %vm280_vm0, %v2271_v16  ;;  %284 = vst.msk [vmem:[#allocation2 + $0x18] sm:$0xff] (!%p2094_p12), %vm280_vm0, %v2271_v16 }
  0x34   : > { %285 = vst.msk [vmem:[#allocation2 + $0x20] sm:$0xff] (!%p2094_p12), %vm280_vm0, %v2271_v16  ;;  %286 = vst.msk [vmem:[#allocation2 + $0x28] sm:$0xff] (!%p2094_p12), %vm280_vm0, %v2271_v16 }
  0x35   : > { %287 = vst.msk [vmem:[#allocation2 + $0x30] sm:$0xff] (!%p2094_p12), %vm280_vm0, %v2271_v16  ;;  %288 = vst.msk [vmem:[#allocation2 + $0x38] sm:$0xff] (!%p2094_p12), %vm280_vm0, %v2271_v16 }
  0x36   : > { %289 = vst.msk [vmem:[#allocation2 + $0x40] sm:$0xff] (!%p2094_p12), %vm280_vm0, %v2271_v16  ;;  %290 = vst.msk [vmem:[#allocation2 + $0x48] sm:$0xff] (!%p2094_p12), %vm280_vm0, %v2271_v16 }
  0x37   : > { %291 = vst.msk [vmem:[#allocation2 + $0x50] sm:$0xff] (!%p2094_p12), %vm280_vm0, %v2271_v16  ;;  %292 = vst.msk [vmem:[#allocation2 + $0x58] sm:$0xff] (!%p2094_p12), %vm280_vm0, %v2271_v16 }
  0x38   : > { %293 = vst.msk [vmem:[#allocation2 + $0x60] sm:$0xff] %vm280_vm0, %v2271_v16  ;;  %294 = vst.msk [vmem:[#allocation2 + $0x68] sm:$0xff] %vm280_vm0, %v2271_v16 }
  0x39   : > { %295 = vst.msk [vmem:[#allocation2 + $0x70] sm:$0xff] %vm280_vm0, %v2271_v16  ;;  %296 = vst.msk [vmem:[#allocation2 + $0x78] sm:$0xff] %vm280_vm0, %v2271_v16 }
  0x3a   : > { %297 = vst.msk [vmem:[#allocation2 + $0x80] sm:$0xff] %vm280_vm0, %v2271_v16  ;;  %298 = vst.msk [vmem:[#allocation2 + $0x88] sm:$0xff] %vm280_vm0, %v2271_v16 }
  0x3b   : > { %299 = vst.msk [vmem:[#allocation2 + $0x90] sm:$0xff] %vm280_vm0, %v2271_v16  ;;  %300 = vst.msk [vmem:[#allocation2 + $0x98] sm:$0xff] %vm280_vm0, %v2271_v16 }
  0x3c   : > { %301 = vst.msk [vmem:[#allocation2 + $0xa0] sm:$0xff] %vm280_vm0, %v2271_v16  ;;  %302 = vst.msk [vmem:[#allocation2 + $0xa8] sm:$0xff] %vm280_vm0, %v2271_v16 }
  0x3d   : > { %303 = vst.msk [vmem:[#allocation2 + $0xb0] sm:$0xff] %vm280_vm0, %v2271_v16  ;;  %304 = vst.msk [vmem:[#allocation2 + $0xb8] sm:$0xff] %vm280_vm0, %v2271_v16 }
  0x3e   : > { %305 = vst.msk [vmem:[#allocation2 + $0xc0] sm:$0xff] %vm280_vm0, %v2271_v16  ;;  %306 = vst.msk [vmem:[#allocation2 + $0xc8] sm:$0xff] %vm280_vm0, %v2271_v16 }
  0x3f   : > { %307 = vst.msk [vmem:[#allocation2 + $0xd0] sm:$0xff] %vm280_vm0, %v2271_v16  ;;  %308 = vst.msk [vmem:[#allocation2 + $0xd8] sm:$0xff] %vm280_vm0, %v2271_v16 }
  0x40   : > { %309 = vst.msk [vmem:[#allocation2 + $0xe0] sm:$0xff] %vm280_vm0, %v2271_v16  ;;  %310 = vst.msk [vmem:[#allocation2 + $0xe8] sm:$0xff] %vm280_vm0, %v2271_v16 }
  0x41   : > { %311 = vst.msk [vmem:[#allocation2 + $0xf0] sm:$0xff] %vm280_vm0, %v2271_v16  ;;  %312 = vst.msk [vmem:[#allocation2 + $0xf8] sm:$0xff] %vm280_vm0, %v2271_v16 }
  0x42   : > { %313 = vst.msk [vmem:[#allocation3] sm:$0xff] %vm280_vm0, %v2272_v17  ;;  %314 = vst.msk [vmem:[#allocation3 + $0x8] sm:$0xff] %vm280_vm0, %v2272_v17 }
  0x43   : > { %315 = vst.msk [vmem:[#allocation3 + $0x10] sm:$0xff] %vm280_vm0, %v2272_v17  ;;  %316 = vst.msk [vmem:[#allocation3 + $0x18] sm:$0xff] %vm280_vm0, %v2272_v17 }
  0x44   : > { %317 = vst.msk [vmem:[#allocation3 + $0x20] sm:$0xff] %vm280_vm0, %v2272_v17  ;;  %318 = vst.msk [vmem:[#allocation3 + $0x28] sm:$0xff] %vm280_vm0, %v2272_v17 }
  0x45   : > { %319 = vst.msk [vmem:[#allocation3 + $0x30] sm:$0xff] %vm280_vm0, %v2272_v17  ;;  %320 = vst.msk [vmem:[#allocation3 + $0x38] sm:$0xff] %vm280_vm0, %v2272_v17 }
  0x46   : > { %321 = vst.msk [vmem:[#allocation3 + $0x40] sm:$0xff] %vm280_vm0, %v2272_v17  ;;  %322 = vst.msk [vmem:[#allocation3 + $0x48] sm:$0xff] %vm280_vm0, %v2272_v17 }
  0x47   : > { %323 = vst.msk [vmem:[#allocation3 + $0x50] sm:$0xff] %vm280_vm0, %v2272_v17  ;;  %324 = vst.msk [vmem:[#allocation3 + $0x58] sm:$0xff] %vm280_vm0, %v2272_v17 }
  0x48   : > { %325 = vst.msk [vmem:[#allocation3 + $0x60] sm:$0xff] %vm280_vm0, %v2272_v17  ;;  %326 = vst.msk [vmem:[#allocation3 + $0x68] sm:$0xff] %vm280_vm0, %v2272_v17 }
  0x49   : > { %327 = vst.msk [vmem:[#allocation3 + $0x70] sm:$0xff] %vm280_vm0, %v2272_v17  ;;  %328 = vst.msk [vmem:[#allocation3 + $0x78] sm:$0xff] %vm280_vm0, %v2272_v17 }
  0x4a   : > { %329 = vst.msk [vmem:[#allocation3 + $0x80] sm:$0xff] %vm280_vm0, %v2272_v17  ;;  %330 = vst.msk [vmem:[#allocation3 + $0x88] sm:$0xff] %vm280_vm0, %v2272_v17 }
  0x4b   : > { %331 = vst.msk [vmem:[#allocation3 + $0x90] sm:$0xff] %vm280_vm0, %v2272_v17  ;;  %332 = vst.msk [vmem:[#allocation3 + $0x98] sm:$0xff] %vm280_vm0, %v2272_v17 }
  0x4c   : > { %333 = vst.msk [vmem:[#allocation3 + $0xa0] sm:$0xff] %vm280_vm0, %v2272_v17  ;;  %334 = vst.msk [vmem:[#allocation3 + $0xa8] sm:$0xff] %vm280_vm0, %v2272_v17 }
  0x4d   : > { %335 = vst.msk [vmem:[#allocation3 + $0xb0] sm:$0xff] %vm280_vm0, %v2272_v17  ;;  %336 = vst.msk [vmem:[#allocation3 + $0xb8] sm:$0xff] %vm280_vm0, %v2272_v17 }
  0x4e   : > { %337 = vst.msk [vmem:[#allocation3 + $0xc0] sm:$0xff] %vm280_vm0, %v2272_v17  ;;  %338 = vst.msk [vmem:[#allocation3 + $0xc8] sm:$0xff] %vm280_vm0, %v2272_v17 }
  0x4f   : > { %339 = vst.msk [vmem:[#allocation3 + $0xd0] sm:$0xff] %vm280_vm0, %v2272_v17  ;;  %340 = vst.msk [vmem:[#allocation3 + $0xd8] sm:$0xff] %vm280_vm0, %v2272_v17 }
  0x50   : > { %341 = vst.msk [vmem:[#allocation3 + $0xe0] sm:$0xff] %vm280_vm0, %v2272_v17  ;;  %342 = vst.msk [vmem:[#allocation3 + $0xe8] sm:$0xff] %vm280_vm0, %v2272_v17 }
  0x51   : > { %343 = vst.msk [vmem:[#allocation3 + $0xf0] sm:$0xff] %vm280_vm0, %v2272_v17  ;;  %344 = vst.msk [vmem:[#allocation3 + $0xf8] sm:$0xff] %vm280_vm0, %v2272_v17 }
  0x52 PF: > { %v379_v18 = vld [vmem:[%s2390_s26 + $0x8] sm:$0xff]  ;;  %v381_v19 = vld [vmem:[%s2390_s26 + $0x18] sm:$0xff]  ;;  %v378_v20 = vld [vmem:[%s2390_s26] sm:$0xff]  ;;  %v2273_v25 = vmov 0.0   ;;  %vm394_vm1 = vcmask 523264   ;;  %v4123_v11 = vlaneseq  ;;  %vm1788_vm2 = vcmask 7168  }
  0x53   : > { %v2132_v21 = vpack.c.bf16 %v381_v19, %v379_v18  ;;  %v380_v22 = vld [vmem:[%s2390_s26 + $0x10] sm:$0xff]  ;;  %v383_v23 = vld [vmem:[%s2390_s26 + $0x28] sm:$0xff]  ;;  %v385_v24 = vld [vmem:[%s2390_s26 + $0x38] sm:$0xff]  ;;  %555 = vmatprep.mubr.f32.mxu0 %v2273_v25  ;;  %651 = vmatprep.mubr.f32.mxu1 %v2273_v25  ;;  %s2127_s29 = sshll.u32 %s2253_s14, 8  ;;  %p2128_p13 = scmp.ne.s32.totalorder %s2253_s14, 1 }
  0x54   : > { %v2134_v26 = vpack.c.bf16 %v380_v22, %v378_v20  ;;  %v2136_v27 = vpack.c.bf16 %v385_v24, %v383_v23  ;;  %v382_v28 = vld [vmem:[%s2390_s26 + $0x20] sm:$0xff]  ;;  %v384_v29 = vld [vmem:[%s2390_s26 + $0x30] sm:$0xff]  ;;  %v387_v30 = vld [vmem:[%s2390_s26 + $0x48] sm:$0xff]  ;;  %v814_v12 = vshrl.u32 %v4123_v11, 7 }
  0x55   : > { %2133 = vmatprep.subr.bf16.mxu0 %v2132_v21  ;;  %2148 = vmatprep.subr.bf16.mxu1 %v2132_v21  ;;  %v389_v31 = vld [vmem:[%s2390_s26 + $0x58] sm:$0xff]  ;;  %v2138_v32 = vpack.c.bf16 %v384_v29, %v382_v28  ;;  %v386_v34 = vld [vmem:[%s2390_s26 + $0x40] sm:$0xff]  ;;  %v388_v35 = vld [vmem:[%s2390_s26 + $0x50] sm:$0xff] }
  0x56   : > { %2135 = vmatpush1.bf16.msra.mxu0 %v2134_v26  ;;  %2152 = vmatpush1.bf16.msra.mxu1 %v2134_v26  ;;  %v2140_v33 = vpack.c.bf16 %v389_v31, %v387_v30  ;;  %v391_v36 = vld [vmem:[%s2390_s26 + $0x68] sm:$0xff]  ;;  %v393_v37 = vld [vmem:[%s2390_s26 + $0x78] sm:$0xff]  ;;  %v2142_v38 = vpack.c.bf16 %v388_v35, %v386_v34  ;;  %v390_v40 = vld [vmem:[%s2390_s26 + $0x60] sm:$0xff]  ;;  %v815_v13 = vsub.s32 0, %v814_v12  ;;  %v819_v15 = vsub.s32 1, %v814_v12 }
  0x57   : > { %2137 = vmatprep.subr.bf16.mxu0 %v2136_v27  ;;  %2149 = vmatprep.subr.bf16.mxu1 %v2136_v27  ;;  %v2144_v39 = vpack.c.bf16 %v393_v37, %v391_v36  ;;  %v392_v41 = vld [vmem:[%s2390_s26 + $0x70] sm:$0xff]  ;;  %v345_v43 = vld [vmem:[%s2377_s11] sm:$0xff]  ;;  %v346_v45 = vld [vmem:[%s2377_s11 + $0x8] sm:$0xff] }
  0x58   : > { %v2146_v42 = vpack.c.bf16 %v392_v41, %v390_v40  ;;  %v361_v44 = vld [vmem:[%s2377_s11 + $0x80] sm:$0xff]  ;;  %v362_v46 = vld [vmem:[%s2377_s11 + $0x88] sm:$0xff]  ;;  %v347_v47 = vld [vmem:[%s2377_s11 + $0x10] sm:$0xff] }
  0x59   : > { %v363_v48 = vld [vmem:[%s2377_s11 + $0x90] sm:$0xff]  ;;  %v348_v49 = vld [vmem:[%s2377_s11 + $0x18] sm:$0xff]  ;;  %v349_v51 = vld [vmem:[%s2377_s11 + $0x20] sm:$0xff] }
  0x5a   : > { %2139 = vmatpush1.bf16.msra.mxu0 %v2138_v32  ;;  %2153 = vmatpush1.bf16.msra.mxu1 %v2138_v32  ;;  %v364_v50 = vld [vmem:[%s2377_s11 + $0x98] sm:$0xff]  ;;  %v365_v52 = vld [vmem:[%s2377_s11 + $0xa0] sm:$0xff]  ;;  %v350_v53 = vld [vmem:[%s2377_s11 + $0x28] sm:$0xff] }
  0x5b   : > { %2141 = vmatprep.subr.bf16.mxu0 %v2140_v33  ;;  %2150 = vmatprep.subr.bf16.mxu1 %v2140_v33  ;;  %v366_v54 = vld [vmem:[%s2377_s11 + $0xa8] sm:$0xff]  ;;  %v351_v55 = vld [vmem:[%s2377_s11 + $0x30] sm:$0xff]  ;;  %v352_v57 = vld [vmem:[%s2377_s11 + $0x38] sm:$0xff] }
  0x5c   : > { %v367_v56 = vld [vmem:[%s2377_s11 + $0xb0] sm:$0xff]  ;;  %v368_v58 = vld [vmem:[%s2377_s11 + $0xb8] sm:$0xff]  ;;  %v353_v59 = vld [vmem:[%s2377_s11 + $0x40] sm:$0xff] }
  0x5d   : > { %v369_v60 = vld [vmem:[%s2377_s11 + $0xc0] sm:$0xff]  ;;  %v354_v61 = vld [vmem:[%s2377_s11 + $0x48] sm:$0xff]  ;;  %v355_v63 = vld [vmem:[%s2377_s11 + $0x50] sm:$0xff] }
  0x5e   : > { %2143 = vmatpush1.bf16.msra.mxu0 %v2142_v38  ;;  %2154 = vmatpush1.bf16.msra.mxu1 %v2142_v38  ;;  %v370_v62 = vld [vmem:[%s2377_s11 + $0xc8] sm:$0xff]  ;;  %v371_v0 = vld [vmem:[%s2377_s11 + $0xd0] sm:$0xff]  ;;  %v356_v1 = vld [vmem:[%s2377_s11 + $0x58] sm:$0xff] }
  0x5f   : > { %2145 = vmatprep.subr.bf16.mxu0 %v2144_v39  ;;  %2151 = vmatprep.subr.bf16.mxu1 %v2144_v39  ;;  %v372_v2 = vld [vmem:[%s2377_s11 + $0xd8] sm:$0xff]  ;;  %v357_v3 = vld [vmem:[%s2377_s11 + $0x60] sm:$0xff]  ;;  %v358_v5 = vld [vmem:[%s2377_s11 + $0x68] sm:$0xff] }
  0x60   : > { %v373_v4 = vld [vmem:[%s2377_s11 + $0xe0] sm:$0xff]  ;;  %v374_v6 = vld [vmem:[%s2377_s11 + $0xe8] sm:$0xff]  ;;  %v359_v7 = vld [vmem:[%s2377_s11 + $0x70] sm:$0xff] }
  0x61   : > { %v375_v8 = vld [vmem:[%s2377_s11 + $0xf0] sm:$0xff]  ;;  %v360_v9 = vld [vmem:[%s2377_s11 + $0x78] sm:$0xff]  ;;  %v377_v14 = vld [vmem:[%s268_s25] sm:$0x3] }
  0x62   : > { %2147 = vmatpush1.bf16.msra.mxu0 %v2146_v42  ;;  %2155 = vmatpush1.bf16.msra.mxu1 %v2146_v42  ;;  %v376_v10 = vld [vmem:[%s2377_s11 + $0xf8] sm:$0xff]  ;;  %v2575_v16 = vrot.slane %v377_v14, %v815_v13  ;;  %v2577_v19 = vrot.slane %v377_v14, %v819_v15 }
  0x65   : > { %2095 = vmatmul.mubr.msk.f32.vlgmr.msra.gmra.mrb[0].mxu0 %vm394_vm1, %v345_v43  ;;  %2111 = vmatmul.mubr.msk.f32.vlgmr.msra.gmra.mrb[0].mxu1 %vm394_vm1, %v361_v44 }
  0x66   : > { %561 = vmatprep.mubr.f32.mxu0 %v2273_v25  ;;  %657 = vmatprep.mubr.f32.mxu1 %v2273_v25 }
  0x69   : > { %2096 = vmatmul.mubr.msk.f32.gmra.mrb[2].mxu0 %vm394_vm1, %v346_v45  ;;  %2112 = vmatmul.mubr.msk.f32.gmra.mrb[2].mxu1 %vm394_vm1, %v362_v46 }
  0x6a   : > { %567 = vmatprep.mubr.f32.mxu0 %v2273_v25  ;;  %663 = vmatprep.mubr.f32.mxu1 %v2273_v25 }
  0x6d   : > { %2097 = vmatmul.mubr.msk.f32.gmra.mrb[4].mxu0 %vm394_vm1, %v347_v47  ;;  %2113 = vmatmul.mubr.msk.f32.gmra.mrb[4].mxu1 %vm394_vm1, %v363_v48 }
  0x6e   : > { %573 = vmatprep.mubr.f32.mxu0 %v2273_v25  ;;  %669 = vmatprep.mubr.f32.mxu1 %v2273_v25 }
  0x71   : > { %2098 = vmatmul.mubr.msk.f32.gmra.mrb[6].mxu0 %vm394_vm1, %v348_v49  ;;  %2114 = vmatmul.mubr.msk.f32.gmra.mrb[6].mxu1 %vm394_vm1, %v364_v50 }
  0x72   : > { %579 = vmatprep.mubr.f32.mxu0 %v2273_v25  ;;  %675 = vmatprep.mubr.f32.mxu1 %v2273_v25 }
  0x75   : > { %2099 = vmatmul.mubr.msk.f32.gmra.mrb[8].mxu0 %vm394_vm1, %v349_v51  ;;  %2115 = vmatmul.mubr.msk.f32.gmra.mrb[8].mxu1 %vm394_vm1, %v365_v52 }
  0x76   : > { %585 = vmatprep.mubr.f32.mxu0 %v2273_v25  ;;  %681 = vmatprep.mubr.f32.mxu1 %v2273_v25 }
  0x79   : > { %2100 = vmatmul.mubr.msk.f32.gmra.mrb[10].mxu0 %vm394_vm1, %v350_v53  ;;  %2116 = vmatmul.mubr.msk.f32.gmra.mrb[10].mxu1 %vm394_vm1, %v366_v54 }
  0x7a   : > { %591 = vmatprep.mubr.f32.mxu0 %v2273_v25  ;;  %687 = vmatprep.mubr.f32.mxu1 %v2273_v25 }
  0x7d   : > { %2101 = vmatmul.mubr.msk.f32.gmra.mrb[12].mxu0 %vm394_vm1, %v351_v55  ;;  %2117 = vmatmul.mubr.msk.f32.gmra.mrb[12].mxu1 %vm394_vm1, %v367_v56 }
  0x7e   : > { %597 = vmatprep.mubr.f32.mxu0 %v2273_v25  ;;  %693 = vmatprep.mubr.f32.mxu1 %v2273_v25 }
  0x81   : > { %2102 = vmatmul.mubr.msk.f32.gmra.mrb[14].mxu0 %vm394_vm1, %v352_v57  ;;  %2118 = vmatmul.mubr.msk.f32.gmra.mrb[14].mxu1 %vm394_vm1, %v368_v58 }
  0x82   : > { %603 = vmatprep.mubr.f32.mxu0 %v2273_v25  ;;  %699 = vmatprep.mubr.f32.mxu1 %v2273_v25 }
  0x85   : > { %2103 = vmatmul.mubr.msk.f32.gmra.mrb[16].mxu0 %vm394_vm1, %v353_v59  ;;  %2119 = vmatmul.mubr.msk.f32.gmra.mrb[16].mxu1 %vm394_vm1, %v369_v60 }
  0x86   : > { %609 = vmatprep.mubr.f32.mxu0 %v2273_v25  ;;  %705 = vmatprep.mubr.f32.mxu1 %v2273_v25 }
  0x89   : > { %2104 = vmatmul.mubr.msk.f32.gmra.mrb[18].mxu0 %vm394_vm1, %v354_v61  ;;  %2120 = vmatmul.mubr.msk.f32.gmra.mrb[18].mxu1 %vm394_vm1, %v370_v62 }
  0x8a   : > { %615 = vmatprep.mubr.f32.mxu0 %v2273_v25  ;;  %711 = vmatprep.mubr.f32.mxu1 %v2273_v25 }
  0x8d   : > { %2105 = vmatmul.mubr.msk.f32.gmra.mrb[20].mxu0 %vm394_vm1, %v355_v63  ;;  %2121 = vmatmul.mubr.msk.f32.gmra.mrb[20].mxu1 %vm394_vm1, %v371_v0 }
  0x8e   : > { %621 = vmatprep.mubr.f32.mxu0 %v2273_v25  ;;  %717 = vmatprep.mubr.f32.mxu1 %v2273_v25 }
  0x91   : > { %2106 = vmatmul.mubr.msk.f32.gmra.mrb[22].mxu0 %vm394_vm1, %v356_v1  ;;  %2122 = vmatmul.mubr.msk.f32.gmra.mrb[22].mxu1 %vm394_vm1, %v372_v2 }
  0x92   : > { %627 = vmatprep.mubr.f32.mxu0 %v2273_v25  ;;  %723 = vmatprep.mubr.f32.mxu1 %v2273_v25 }
  0x95   : > { %2107 = vmatmul.mubr.msk.f32.gmra.mrb[24].mxu0 %vm394_vm1, %v357_v3  ;;  %2123 = vmatmul.mubr.msk.f32.gmra.mrb[24].mxu1 %vm394_vm1, %v373_v4 }
  0x96   : > { %633 = vmatprep.mubr.f32.mxu0 %v2273_v25  ;;  %729 = vmatprep.mubr.f32.mxu1 %v2273_v25 }
  0x99   : > { %2108 = vmatmul.mubr.msk.f32.gmra.mrb[26].mxu0 %vm394_vm1, %v358_v5  ;;  %2124 = vmatmul.mubr.msk.f32.gmra.mrb[26].mxu1 %vm394_vm1, %v374_v6 }
  0x9a   : > { %639 = vmatprep.mubr.f32.mxu0 %v2273_v25  ;;  %735 = vmatprep.mubr.f32.mxu1 %v2273_v25 }
  0x9d   : > { %2109 = vmatmul.mubr.msk.f32.gmra.mrb[28].mxu0 %vm394_vm1, %v359_v7  ;;  %2125 = vmatmul.mubr.msk.f32.gmra.mrb[28].mxu1 %vm394_vm1, %v375_v8 }
  0x9e   : > { %645 = vmatprep.mubr.f32.mxu0 %v2273_v25  ;;  %741 = vmatprep.mubr.f32.mxu1 %v2273_v25 }
  0xa1   : > { %2110 = vmatmul.mubr.msk.f32.gmra.mrb[30].mxu0 %vm394_vm1, %v360_v9  ;;  %2126 = vmatmul.mubr.msk.f32.gmra.mrb[30].mxu1 %vm394_vm1, %v376_v10 }
 0x138   : > { %v557_v17 = vpop.f32.mrb[0].mxu0  ;;  %v653_v18 = vpop.f32.mrb[0].mxu1 }
 0x139   : > { %v748_v20 = vmul.f32 2.0, %v557_v17  ;;  %v559_v21 = vpop.f32.mrb[1].mxu0  ;;  %v780_v22 = vmul.f32 2.0, %v653_v18  ;;  %v655_v23 = vpop.f32.mrb[1].mxu1 }
 0x13a   : > { %v749_v24 = vmul.f32 2.0, %v559_v21  ;;  %v781_v25 = vmul.f32 2.0, %v655_v23 }
 0x13b   : > { %v2580_v26 = vsub.f32 %v2575_v16, %v748_v20  ;;  %v2583_v27 = vsub.f32 %v2575_v16, %v780_v22 }
 0x13c   : > { %v2586_v28 = vsub.f32 %v2577_v19, %v781_v25  ;;  %v659_v29 = vpop.f32.mrb[2].mxu1  ;;  %v563_v30 = vpop.f32.mrb[2].mxu0  ;;  %v2589_v31 = vsub.f32 %v2577_v19, %v749_v24 }
 0x13d   : > { %v782_v32 = vmul.f32 2.0, %v659_v29  ;;  %v661_v33 = vpop.f32.mrb[3].mxu1  ;;  %v750_v34 = vmul.f32 2.0, %v563_v30  ;;  %v565_v35 = vpop.f32.mrb[3].mxu0 }
 0x13e   : > { %v783_v36 = vmul.f32 2.0, %v661_v33  ;;  %v751_v37 = vmul.f32 2.0, %v565_v35  ;;  %v887_v38 = vmin.f32 %v2580_v26, %v2589_v31  ;;  %v935_v45 = vmin.f32 %v2583_v27, %v2586_v28 }
 0x13f   : > { %v2594_v39 = vsub.f32 %v2575_v16, %v750_v34  ;;  %v2597_v40 = vsub.f32 %v2575_v16, %v782_v32 }
 0x140   : > { %v2600_v41 = vsub.f32 %v2577_v19, %v751_v37  ;;  %888 = vmin.xlane.f32.xlu0 %v887_v38  ;;  %v569_v42 = vpop.f32.mrb[4].mxu0  ;;  %v2603_v43 = vsub.f32 %v2577_v19, %v783_v36  ;;  %v665_v44 = vpop.f32.mrb[4].mxu1 }
 0x141   : > { %v752_v46 = vmul.f32 2.0, %v569_v42  ;;  %v571_v47 = vpop.f32.mrb[5].mxu0  ;;  %v784_v48 = vmul.f32 2.0, %v665_v44  ;;  %v667_v49 = vpop.f32.mrb[5].mxu1 }
 0x142   : > { %v753_v50 = vmul.f32 2.0, %v571_v47  ;;  %v938_v51 = vmin.f32 %v2597_v40, %v2603_v43  ;;  %v785_v52 = vmul.f32 2.0, %v667_v49  ;;  %v890_v54 = vmin.f32 %v2594_v39, %v2600_v41 }
 0x143   : > { %v2610_v53 = vsub.f32 %v2575_v16, %v752_v46  ;;  %v2618_v56 = vsub.f32 %v2575_v16, %v784_v48 }
 0x144   : > { %v2615_v55 = vsub.f32 %v2577_v19, %v753_v50  ;;  %939 = vmin.xlane.f32.xlu1 %v938_v51  ;;  %936 = vmin.xlane.f32.xlu0 %v935_v45  ;;  %v575_v57 = vpop.f32.mrb[6].mxu0  ;;  %v2621_v58 = vsub.f32 %v2577_v19, %v785_v52  ;;  %v671_v59 = vpop.f32.mrb[6].mxu1 }
 0x145   : > { %v754_v60 = vmul.f32 2.0, %v575_v57  ;;  %v577_v61 = vpop.f32.mrb[7].mxu0  ;;  %v786_v62 = vmul.f32 2.0, %v671_v59  ;;  %v673_v63 = vpop.f32.mrb[7].mxu1 }
 0x146   : > { %v755_v0 = vmul.f32 2.0, %v577_v61  ;;  %v893_v1 = vmin.f32 %v2610_v53, %v2615_v55  ;;  %v787_v2 = vmul.f32 2.0, %v673_v63  ;;  %v941_v9 = vmin.f32 %v2618_v56, %v2621_v58 }
 0x147   : > { %v2626_v3 = vsub.f32 %v2575_v16, %v754_v60  ;;  %v2629_v4 = vsub.f32 %v2575_v16, %v786_v62 }
 0x148   : > { %v2632_v5 = vsub.f32 %v2577_v19, %v755_v0  ;;  %891 = vmin.xlane.f32.xlu0 %v890_v54  ;;  %894 = vmin.xlane.f32.xlu1 %v893_v1  ;;  %v581_v6 = vpop.f32.mrb[8].mxu0  ;;  %v2635_v7 = vsub.f32 %v2577_v19, %v787_v2  ;;  %v677_v8 = vpop.f32.mrb[8].mxu1 }
 0x149   : > { %v756_v10 = vmul.f32 2.0, %v581_v6  ;;  %v583_v12 = vpop.f32.mrb[9].mxu0  ;;  %v788_v13 = vmul.f32 2.0, %v677_v8  ;;  %v679_v14 = vpop.f32.mrb[9].mxu1 }
 0x14a   : > { %v757_v15 = vmul.f32 2.0, %v583_v12  ;;  %v896_v17 = vmin.f32 %v2626_v3, %v2632_v5  ;;  %v789_v18 = vmul.f32 2.0, %v679_v14  ;;  %v944_v21 = vmin.f32 %v2629_v4, %v2635_v7 }
 0x14b   : > { %v2642_v20 = vsub.f32 %v2575_v16, %v756_v10  ;;  %v2650_v23 = vsub.f32 %v2575_v16, %v788_v13 }
 0x14c   : > { %v2647_v22 = vsub.f32 %v2577_v19, %v757_v15  ;;  %942 = vmin.xlane.f32.xlu0 %v941_v9  ;;  %897 = vmin.xlane.f32.xlu1 %v896_v17  ;;  %v587_v24 = vpop.f32.mrb[10].mxu0  ;;  %v2653_v25 = vsub.f32 %v2577_v19, %v789_v18  ;;  %v683_v29 = vpop.f32.mrb[10].mxu1 }
 0x14d   : > { %v758_v30 = vmul.f32 2.0, %v587_v24  ;;  %v589_v32 = vpop.f32.mrb[11].mxu0  ;;  %v790_v33 = vmul.f32 2.0, %v683_v29  ;;  %v685_v34 = vpop.f32.mrb[11].mxu1 }
 0x14e   : > { %v759_v35 = vmul.f32 2.0, %v589_v32  ;;  %v899_v36 = vmin.f32 %v2642_v20, %v2647_v22  ;;  %v791_v37 = vmul.f32 2.0, %v685_v34  ;;  %v947_v48 = vmin.f32 %v2650_v23, %v2653_v25 }
 0x14f   : > { %v2658_v38 = vsub.f32 %v2575_v16, %v758_v30  ;;  %v2661_v42 = vsub.f32 %v2575_v16, %v790_v33 }
 0x150   : > { %v2664_v44 = vsub.f32 %v2577_v19, %v759_v35  ;;  %945 = vmin.xlane.f32.xlu1 %v944_v21  ;;  %900 = vmin.xlane.f32.xlu0 %v899_v36  ;;  %v593_v45 = vpop.f32.mrb[12].mxu0  ;;  %v2667_v46 = vsub.f32 %v2577_v19, %v791_v37  ;;  %v689_v47 = vpop.f32.mrb[12].mxu1 }
 0x151   : > { %v760_v49 = vmul.f32 2.0, %v593_v45  ;;  %v595_v50 = vpop.f32.mrb[13].mxu0  ;;  %v792_v51 = vmul.f32 2.0, %v689_v47  ;;  %v691_v52 = vpop.f32.mrb[13].mxu1 }
 0x152   : > { %v761_v54 = vmul.f32 2.0, %v595_v50  ;;  %v902_v57 = vmin.f32 %v2658_v38, %v2664_v44  ;;  %v793_v59 = vmul.f32 2.0, %v691_v52  ;;  %v950_v61 = vmin.f32 %v2661_v42, %v2667_v46 }
 0x153   : > { %v2674_v60 = vsub.f32 %v2575_v16, %v760_v49  ;;  %v2682_v63 = vsub.f32 %v2575_v16, %v792_v51 }
 0x154   : > { %v2679_v62 = vsub.f32 %v2577_v19, %v761_v54  ;;  %948 = vmin.xlane.f32.xlu0 %v947_v48  ;;  %903 = vmin.xlane.f32.xlu1 %v902_v57  ;;  %v599_v0 = vpop.f32.mrb[14].mxu0  ;;  %v2685_v1 = vsub.f32 %v2577_v19, %v793_v59  ;;  %v695_v2 = vpop.f32.mrb[14].mxu1 }
 0x155   : > { %v762_v6 = vmul.f32 2.0, %v599_v0  ;;  %v601_v8 = vpop.f32.mrb[15].mxu0  ;;  %v794_v9 = vmul.f32 2.0, %v695_v2  ;;  %v697_v10 = vpop.f32.mrb[15].mxu1 }
 0x156   : > { %v763_v12 = vmul.f32 2.0, %v601_v8  ;;  %v905_v13 = vmin.f32 %v2674_v60, %v2679_v62  ;;  %v795_v14 = vmul.f32 2.0, %v697_v10  ;;  %v953_v30 = vmin.f32 %v2682_v63, %v2685_v1 }
 0x157   : > { %v2690_v15 = vsub.f32 %v2575_v16, %v762_v6  ;;  %v2693_v17 = vsub.f32 %v2575_v16, %v794_v9 }
 0x158   : > { %v2696_v18 = vsub.f32 %v2577_v19, %v763_v12  ;;  %951 = vmin.xlane.f32.xlu1 %v950_v61  ;;  %906 = vmin.xlane.f32.xlu0 %v905_v13  ;;  %v605_v21 = vpop.f32.mrb[16].mxu0  ;;  %v2699_v24 = vsub.f32 %v2577_v19, %v795_v14  ;;  %v701_v29 = vpop.f32.mrb[16].mxu1 }
 0x159   : > { %v764_v32 = vmul.f32 2.0, %v605_v21  ;;  %v607_v33 = vpop.f32.mrb[17].mxu0  ;;  %v796_v34 = vmul.f32 2.0, %v701_v29  ;;  %v703_v35 = vpop.f32.mrb[17].mxu1 }
 0x15a   : > { %v765_v36 = vmul.f32 2.0, %v607_v33  ;;  %v908_v37 = vmin.f32 %v2690_v15, %v2696_v18  ;;  %v797_v45 = vmul.f32 2.0, %v703_v35  ;;  %v956_v48 = vmin.f32 %v2693_v17, %v2699_v24 }
 0x15b   : > { %v2706_v47 = vsub.f32 %v2575_v16, %v764_v32  ;;  %v2714_v50 = vsub.f32 %v2575_v16, %v796_v34 }
 0x15c   : > { %v2711_v49 = vsub.f32 %v2577_v19, %v765_v36  ;;  %954 = vmin.xlane.f32.xlu0 %v953_v30  ;;  %909 = vmin.xlane.f32.xlu1 %v908_v37  ;;  %v611_v51 = vpop.f32.mrb[18].mxu0  ;;  %v2717_v52 = vsub.f32 %v2577_v19, %v797_v45  ;;  %v707_v54 = vpop.f32.mrb[18].mxu1 }
 0x15d   : > { %v766_v57 = vmul.f32 2.0, %v611_v51  ;;  %v613_v59 = vpop.f32.mrb[19].mxu0  ;;  %v798_v61 = vmul.f32 2.0, %v707_v54  ;;  %v709_v0 = vpop.f32.mrb[19].mxu1 }
 0x15e   : > { %v767_v2 = vmul.f32 2.0, %v613_v59  ;;  %v911_v6 = vmin.f32 %v2706_v47, %v2711_v49  ;;  %v799_v8 = vmul.f32 2.0, %v709_v0  ;;  %v959_v29 = vmin.f32 %v2714_v50, %v2717_v52 }
 0x15f   : > { %v2722_v9 = vsub.f32 %v2575_v16, %v766_v57  ;;  %v2725_v10 = vsub.f32 %v2575_v16, %v798_v61 }
 0x160   : > { %v2728_v12 = vsub.f32 %v2577_v19, %v767_v2  ;;  %957 = vmin.xlane.f32.xlu1 %v956_v48  ;;  %912 = vmin.xlane.f32.xlu0 %v911_v6  ;;  %v617_v13 = vpop.f32.mrb[20].mxu0  ;;  %v2731_v14 = vsub.f32 %v2577_v19, %v799_v8  ;;  %v713_v21 = vpop.f32.mrb[20].mxu1 }
 0x161   : > { %v768_v30 = vmul.f32 2.0, %v617_v13  ;;  %v619_v32 = vpop.f32.mrb[21].mxu0  ;;  %v800_v33 = vmul.f32 2.0, %v713_v21  ;;  %v715_v34 = vpop.f32.mrb[21].mxu1 }
 0x162   : > { %v769_v35 = vmul.f32 2.0, %v619_v32  ;;  %v914_v36 = vmin.f32 %v2722_v9, %v2728_v12  ;;  %v801_v37 = vmul.f32 2.0, %v715_v34  ;;  %v962_v48 = vmin.f32 %v2725_v10, %v2731_v14 }
 0x163   : > { %v2738_v45 = vsub.f32 %v2575_v16, %v768_v30  ;;  %v2746_v54 = vsub.f32 %v2575_v16, %v800_v33 }
 0x164   : > { %v2743_v51 = vsub.f32 %v2577_v19, %v769_v35  ;;  %960 = vmin.xlane.f32.xlu0 %v959_v29  ;;  %915 = vmin.xlane.f32.xlu1 %v914_v36  ;;  %v623_v57 = vpop.f32.mrb[22].mxu0  ;;  %v2749_v59 = vsub.f32 %v2577_v19, %v801_v37  ;;  %v719_v61 = vpop.f32.mrb[22].mxu1 }
 0x165   : > { %v770_v0 = vmul.f32 2.0, %v623_v57  ;;  %v625_v2 = vpop.f32.mrb[23].mxu0  ;;  %v802_v6 = vmul.f32 2.0, %v719_v61  ;;  %v721_v8 = vpop.f32.mrb[23].mxu1 }
 0x166   : > { %4226 = vst [vmem:[#allocation5_spill] sm:$0xff] %v2749_v59  ;;  %v771_v13 = vmul.f32 2.0, %v625_v2  ;;  %v917_v21 = vmin.f32 %v2738_v45, %v2743_v51  ;;  %v803_v30 = vmul.f32 2.0, %v721_v8  ;;  %v965_v37 = vmin.f32 %v2746_v54, %v2749_v59 }
 0x167   : > { %v2754_v32 = vsub.f32 %v2575_v16, %v770_v0  ;;  %v2757_v29 = vsub.f32 %v2575_v16, %v802_v6 }
 0x168   : > { %v2760_v33 = vsub.f32 %v2577_v19, %v771_v13  ;;  %963 = vmin.xlane.f32.xlu1 %v962_v48  ;;  %918 = vmin.xlane.f32.xlu0 %v917_v21  ;;  %v629_v34 = vpop.f32.mrb[24].mxu0  ;;  %v2763_v35 = vsub.f32 %v2577_v19, %v803_v30  ;;  %v725_v36 = vpop.f32.mrb[24].mxu1 }
 0x169   : > { %4227 = vst [vmem:[#allocation6_spill] sm:$0xff] %v2754_v32  ;;  %4228 = vst [vmem:[#allocation7_spill] sm:$0xff] %v2757_v29  ;;  %v772_v57 = vmul.f32 2.0, %v629_v34  ;;  %v631_v61 = vpop.f32.mrb[25].mxu0  ;;  %v804_v0 = vmul.f32 2.0, %v725_v36  ;;  %v727_v2 = vpop.f32.mrb[25].mxu1 }
 0x16a   : > { %4229 = vst [vmem:[#allocation8_spill] sm:$0xff] %v2760_v33  ;;  %4230 = vst [vmem:[#allocation9_spill] sm:$0xff] %v2763_v35  ;;  %v773_v8 = vmul.f32 2.0, %v631_v61  ;;  %v920_v6 = vmin.f32 %v2754_v32, %v2760_v33  ;;  %v805_v13 = vmul.f32 2.0, %v727_v2  ;;  %v968_v21 = vmin.f32 %v2757_v29, %v2763_v35 }
 0x16b   : > { %v2770_v48 = vsub.f32 %v2575_v16, %v772_v57  ;;  %v2778_v11 = vsub.f32 %v2575_v16, %v804_v0 }
 0x16c   : > { %v2775_v30 = vsub.f32 %v2577_v19, %v773_v8  ;;  %966 = vmin.xlane.f32.xlu0 %v965_v37  ;;  %921 = vmin.xlane.f32.xlu1 %v920_v6  ;;  %v635_v34 = vpop.f32.mrb[26].mxu0  ;;  %v2781_v36 = vsub.f32 %v2577_v19, %v805_v13  ;;  %v731_v61 = vpop.f32.mrb[26].mxu1 }
 0x16d   : > { %4231 = vst [vmem:[#allocation10_spill] sm:$0xff] %v2770_v48  ;;  %4233 = vst [vmem:[#allocation12_spill] sm:$0xff] %v2778_v11  ;;  %v774_v2 = vmul.f32 2.0, %v635_v34  ;;  %v637_v33 = vpop.f32.mrb[27].mxu0  ;;  %v806_v57 = vmul.f32 2.0, %v731_v61  ;;  %v733_v32 = vpop.f32.mrb[27].mxu1 }
 0x16e   : > { %4232 = vst [vmem:[#allocation11_spill] sm:$0xff] %v2775_v30  ;;  %4234 = vst [vmem:[#allocation13_spill] sm:$0xff] %v2781_v36  ;;  %v775_v59 = vmul.f32 2.0, %v637_v33  ;;  %v923_v35 = vmin.f32 %v2770_v48, %v2775_v30  ;;  %v807_v8 = vmul.f32 2.0, %v733_v32  ;;  %v971_v34 = vmin.f32 %v2778_v11, %v2781_v36 }
 0x16f   : > { %v2786_v29 = vsub.f32 %v2575_v16, %v774_v2  ;;  %v2789_v37 = vsub.f32 %v2575_v16, %v806_v57 }
 0x170   : > { %v2792_v0 = vsub.f32 %v2577_v19, %v775_v59  ;;  %969 = vmin.xlane.f32.xlu1 %v968_v21  ;;  %924 = vmin.xlane.f32.xlu0 %v923_v35  ;;  %v641_v6 = vpop.f32.mrb[28].mxu0  ;;  %v2795_v13 = vsub.f32 %v2577_v19, %v807_v8  ;;  %v737_v33 = vpop.f32.mrb[28].mxu1 }
 0x171   : > { %4235 = vst [vmem:[#allocation14_spill] sm:$0xff] %v2786_v29  ;;  %4236 = vst [vmem:[#allocation15_spill] sm:$0xff] %v2789_v37  ;;  %v776_v32 = vmul.f32 2.0, %v641_v6  ;;  %v643_v61 = vpop.f32.mrb[29].mxu0  ;;  %v808_v2 = vmul.f32 2.0, %v737_v33  ;;  %v739_v30 = vpop.f32.mrb[29].mxu1 }
 0x172   : > { %4237 = vst [vmem:[#allocation16_spill] sm:$0xff] %v2792_v0  ;;  %4238 = vst [vmem:[#allocation17_spill] sm:$0xff] %v2795_v13  ;;  %v777_v48 = vmul.f32 2.0, %v643_v61  ;;  %v926_v57 = vmin.f32 %v2786_v29, %v2792_v0  ;;  %v809_v59 = vmul.f32 2.0, %v739_v30  ;;  %v974_v35 = vmin.f32 %v2789_v37, %v2795_v13 }
 0x173   : > { %v2802_v21 = vsub.f32 %v2575_v16, %v776_v32  ;;  %v2810_v36 = vsub.f32 %v2575_v16, %v808_v2 }
 0x174   : > { %v2807_v8 = vsub.f32 %v2577_v19, %v777_v48  ;;  %972 = vmin.xlane.f32.xlu0 %v971_v34  ;;  %927 = vmin.xlane.f32.xlu1 %v926_v57  ;;  %v647_v6 = vpop.f32.mrb[30].mxu0  ;;  %v2813_v33 = vsub.f32 %v2577_v19, %v809_v59  ;;  %v743_v61 = vpop.f32.mrb[30].mxu1  ;;  %v4239_v59 = vlaneseq }
 0x175   : > { %v778_v30 = vmul.f32 2.0, %v647_v6  ;;  %v649_v0 = vpop.f32.mrb[31].mxu0  ;;  %v810_v32 = vmul.f32 2.0, %v743_v61  ;;  %v745_v29 = vpop.f32.mrb[31].mxu1  ;;  %v2853_v61 = vld [vmem:[#allocation2 + $0x88] sm:$0xff] }
 0x176   : > { %v779_v11 = vmul.f32 2.0, %v649_v0  ;;  %v929_v13 = vmin.f32 %v2802_v21, %v2807_v8  ;;  %v811_v48 = vmul.f32 2.0, %v745_v29  ;;  %v977_v0 = vmin.f32 %v2810_v36, %v2813_v33  ;;  %4242 = vst [vmem:[#allocation20_spill] sm:$0xff] %v2853_v61 }
 0x177   : > { %v2818_v37 = vsub.f32 %v2575_v16, %v778_v30  ;;  %v2821_v34 = vsub.f32 %v2575_v16, %v810_v32 }
 0x178   : > { %v2824_v2 = vsub.f32 %v2577_v19, %v779_v11  ;;  %975 = vmin.xlane.f32.xlu1 %v974_v35  ;;  %930 = vmin.xlane.f32.xlu0 %v929_v13  ;;  %v2827_v57 = vsub.f32 %v2577_v19, %v811_v48  ;;  %v2836_v11 = vand.u32 127, %v4239_v59  ;;  %v2838_v35 = vld [vmem:[#allocation2] sm:$0xff]  ;;  %v2882_v59 = vld [vmem:[#allocation2 + $0x8] sm:$0xff] }
 0x179   : > { %4240 = vst [vmem:[#allocation18_spill] sm:$0xff] %v2838_v35  ;;  %v2858_v48 = vld [vmem:[#allocation2 + $0x80] sm:$0xff]  ;;  %4246 = vst [vmem:[#allocation24_spill] sm:$0xff] %v2882_v59 }
 0x17a   : > { %v932_v29 = vmin.f32 %v2818_v37, %v2824_v2  ;;  %v980_v16 = vmin.f32 %v2821_v34, %v2827_v57  ;;  %v2841_v19 = vadd.s32 128, %v2836_v11  ;;  %4243 = vst [vmem:[#allocation21_spill] sm:$0xff] %v2858_v48 }
 0x17c   : > { %978 = vmin.xlane.f32.xlu0 %v977_v0  ;;  %933 = vmin.xlane.f32.xlu1 %v932_v29 }
 0x180   : > { %981 = vmin.xlane.f32.xlu1 %v980_v16 }
 0x1cd   : > { %v2843_v13 = vpop.xlane.xlu0 %888 }
 0x1ce   : > { %4241 = vst [vmem:[#allocation19_spill] sm:$0xff] %v2843_v13  ;;  %vm986_vm3 = vcmp.eq.f32.partialorder %v2580_v26, %v2843_v13  ;;  %vm987_vm4 = vcmp.eq.f32.partialorder %v2589_v31, %v2843_v13  ;;  %v1853_v6 = vmin.f32 %v2843_v13, %v2838_v35 }
 0x1cf   : > { %v1050_v30 = vsel %vm986_vm3, %v2836_v11, 1073741824  ;;  %v1051_v32 = vsel %vm987_vm4, %v2841_v19, 1073741824 }
 0x1d0   : > { %1885 = vst.msk [vmem:[#allocation2] sm:$0xff] %vm1788_vm2, %v1853_v6  ;;  %vm1114_vm6 = vcmp.lt.s32.totalorder %v1050_v30, %v1051_v32  ;;  %v2885_v6 = vld [vmem:[#allocation2 + $0x10] sm:$0xff] }
 0x1d1   : > { %v2860_v26 = vpop.xlane.xlu1 %939  ;;  %v2862_v31 = vpop.xlane.xlu0 %936  ;;  %v2864_v0 = vsel %vm1114_vm6, %v1050_v30, %v1051_v32  ;;  %4247 = vst [vmem:[#allocation25_spill] sm:$0xff] %v2885_v6 }
 0x1d2   : > { %4244 = vst [vmem:[#allocation22_spill] sm:$0xff] %v2860_v26  ;;  %4245 = vst [vmem:[#allocation23_spill] sm:$0xff] %v2862_v31  ;;  %vm1020_vm7 = vcmp.eq.f32.partialorder %v2597_v40, %v2860_v26  ;;  %vm1021_vm8 = vcmp.eq.f32.partialorder %v2603_v43, %v2860_v26  ;;  %v1870_v29 = vmin.f32 %v2860_v26, %v2853_v61  ;;  %v1117_v30 = vshra.s32 %v2864_v0, 16  ;;  %v2919_v43 = vld [vmem:[#allocation2 + $0x90] sm:$0xff] }
 0x1d3   : > { %vm1018_vm10 = vcmp.eq.f32.partialorder %v2583_v27, %v2862_v31  ;;  %vm1019_vm11 = vcmp.eq.f32.partialorder %v2586_v28, %v2862_v31  ;;  %v1869_v16 = vmin.f32 %v2862_v31, %v2858_v48  ;;  %v1085_v48 = vsel %vm1021_vm8, %v2841_v19, 1073741824  ;;  %4250 = vst [vmem:[#allocation28_spill] sm:$0xff] %v2919_v43  ;;  %v2924_v31 = vld [vmem:[#allocation2 + $0x18] sm:$0xff] }
 0x1d4   : > { %1902 = vst.msk [vmem:[#allocation2 + $0x88] sm:$0xff] %vm1788_vm2, %v1870_v29  ;;  %v1082_v32 = vsel %vm1018_vm10, %v2836_v11, 1073741824  ;;  %v1083_v27 = vsel %vm1019_vm11, %v2841_v19, 1073741824  ;;  %v1084_v29 = vsel %vm1020_vm7, %v2836_v11, 1073741824  ;;  %v2922_v26 = vcvt.s32.f32 %v1117_v30  ;;  %4252 = vst [vmem:[#allocation30_spill] sm:$0xff] %v2924_v31 }
 0x1d5   : > { %1901 = vst.msk [vmem:[#allocation2 + $0x80] sm:$0xff] %vm1788_vm2, %v1869_v16  ;;  %v2891_v28 = vpop.xlane.xlu0 %891  ;;  %v2893_v61 = vpop.xlane.xlu1 %894  ;;  %vm1370_vm13 = vcmp.lt.s32.totalorder %v1082_v32, %v1083_v27 }
 0x1d6   : > { %4248 = vst [vmem:[#allocation26_spill] sm:$0xff] %v2891_v28  ;;  %4249 = vst [vmem:[#allocation27_spill] sm:$0xff] %v2893_v61  ;;  %vm988_vm14 = vcmp.eq.f32.partialorder %v2594_v39, %v2891_v28  ;;  %vm989_vm15 = vcmp.eq.f32.partialorder %v2600_v41, %v2891_v28  ;;  %v1854_v16 = vmin.f32 %v2891_v28, %v2882_v59  ;;  %1120 = vmin.xlane.f32.xlu0 %v2922_v26 }
 0x1d7   : > { %vm990_vm1 = vcmp.eq.f32.partialorder %v2610_v53, %v2893_v61  ;;  %vm991_vm3 = vcmp.eq.f32.partialorder %v2615_v55, %v2893_v61  ;;  %v1855_v40 = vmin.f32 %v2893_v61, %v2885_v6  ;;  %4251 = vst [vmem:[#allocation29_spill] sm:$0xff] %v2922_v26  ;;  %v2926_v59 = vsel %vm1370_vm13, %v1082_v32, %v1083_v27  ;;  %v2957_v27 = vld [vmem:[#allocation2 + $0x98] sm:$0xff] }
 0x1d8   : > { %1886 = vst.msk [vmem:[#allocation2 + $0x8] sm:$0xff] %vm1788_vm2, %v1854_v16  ;;  %v1054_v53 = vsel %vm990_vm1, %v2836_v11, 1073741824  ;;  %v1055_v55 = vsel %vm991_vm3, %v2841_v19, 1073741824  ;;  %v1373_v6 = vshra.s32 %v2926_v59, 16  ;;  %v1052_v30 = vsel %vm988_vm14, %v2836_v11, 1073741824  ;;  %4255 = vst [vmem:[#allocation33_spill] sm:$0xff] %v2957_v27 }
 0x1d9   : > { %1887 = vst.msk [vmem:[#allocation2 + $0x10] sm:$0xff] %vm1788_vm2, %v1855_v40  ;;  %v2931_v35 = vpop.xlane.xlu0 %942  ;;  %v2933_v13 = vpop.xlane.xlu1 %897  ;;  %vm1146_vm6 = vcmp.lt.s32.totalorder %v1054_v53, %v1055_v55  ;;  %v1053_v32 = vsel %vm989_vm15, %v2841_v19, 1073741824  ;;  %v2962_v16 = vld [vmem:[#allocation2 + $0x20] sm:$0xff]  ;;  %vm1386_vm14 = vcmp.lt.s32.totalorder %v1084_v29, %v1085_v48 }
 0x1da   : > { %4253 = vst [vmem:[#allocation31_spill] sm:$0xff] %v2931_v35  ;;  %4254 = vst [vmem:[#allocation32_spill] sm:$0xff] %v2933_v13  ;;  %vm1022_vm7 = vcmp.eq.f32.partialorder %v2618_v56, %v2931_v35  ;;  %vm1023_vm8 = vcmp.eq.f32.partialorder %v2621_v58, %v2931_v35  ;;  %v1871_v39 = vmin.f32 %v2931_v35, %v2919_v43  ;;  %v2960_v56 = vcvt.s32.f32 %v1373_v6 }
 0x1db   : > { %v1856_v41 = vmin.f32 %v2933_v13, %v2924_v31  ;;  %4256 = vst [vmem:[#allocation34_spill] sm:$0xff] %v2962_v16  ;;  %v2964_v40 = vsel %vm1146_vm6, %v1054_v53, %v1055_v55  ;;  %vm1130_vm13 = vcmp.lt.s32.totalorder %v1052_v30, %v1053_v32  ;;  %v1086_v28 = vsel %vm1022_vm7, %v2836_v11, 1073741824  ;;  %v2992_v55 = vld [vmem:[#allocation2 + $0xa0] sm:$0xff] }
 0x1dc   : > { %1903 = vst.msk [vmem:[#allocation2 + $0x90] sm:$0xff] %vm1788_vm2, %v1871_v39  ;;  %v1149_v31 = vshra.s32 %v2964_v40, 16  ;;  %v2973_v26 = vsel %vm1130_vm13, %v1052_v30, %v1053_v32  ;;  %v1087_v6 = vsel %vm1023_vm8, %v2841_v19, 1073741824  ;;  %1376 = vmin.xlane.f32.xlu0 %v2960_v56  ;;  %4259 = vst [vmem:[#allocation37_spill] sm:$0xff] %v2992_v55  ;;  %v2998_v39 = vld [vmem:[#allocation2 + $0x28] sm:$0xff]  ;;  %vm992_vm8 = vcmp.eq.f32.partialorder %v2626_v3, %v2933_v13 }
 0x1dd   : > { %1888 = vst.msk [vmem:[#allocation2 + $0x18] sm:$0xff] %vm1788_vm2, %v1856_v41  ;;  %v2968_v43 = vpop.xlane.xlu1 %945  ;;  %v2970_v61 = vpop.xlane.xlu0 %900  ;;  %v1133_v32 = vshra.s32 %v2973_v26, 16  ;;  %4260 = vst [vmem:[#allocation38_spill] sm:$0xff] %v2998_v39  ;;  %vm1402_vm7 = vcmp.lt.s32.totalorder %v1086_v28, %v1087_v6  ;;  %v3000_v41 = vsel %vm1386_vm14, %v1084_v29, %v1085_v48  ;;  %vm993_vm13 = vcmp.eq.f32.partialorder %v2632_v5, %v2933_v13  ;;  %v3134_v13 = vld [vmem:[#allocation2 + $0x40] sm:$0xff] }
 0x1de   : > { %4257 = vst [vmem:[#allocation35_spill] sm:$0xff] %v2968_v43  ;;  %4258 = vst [vmem:[#allocation36_spill] sm:$0xff] %v2970_v61  ;;  %v1872_v53 = vmin.f32 %v2968_v43, %v2957_v27  ;;  %vm994_vm1 = vcmp.eq.f32.partialorder %v2642_v20, %v2970_v61  ;;  %vm995_vm3 = vcmp.eq.f32.partialorder %v2647_v22, %v2970_v61  ;;  %v2995_v30 = vcvt.s32.f32 %v1149_v31  ;;  %v3033_v22 = vld [vmem:[#allocation2 + $0xa8] sm:$0xff] }
 0x1df   : > { %v1857_v58 = vmin.f32 %v2970_v61, %v2962_v16  ;;  %4261 = vst [vmem:[#allocation39_spill] sm:$0xff] %v3000_v41  ;;  %v3009_v35 = vsel %vm1402_vm7, %v1086_v28, %v1087_v6  ;;  %v1058_v31 = vsel %vm994_vm1, %v2836_v11, 1073741824  ;;  %v1059_v48 = vsel %vm995_vm3, %v2841_v19, 1073741824  ;;  %4265 = vst [vmem:[#allocation43_spill] sm:$0xff] %v3033_v22 }
 0x1e0   : > { %1904 = vst.msk [vmem:[#allocation2 + $0x98] sm:$0xff] %vm1788_vm2, %v1872_v53  ;;  %1152 = vmin.xlane.f32.xlu0 %v2995_v30  ;;  %v3022_v29 = vcvt.s32.f32 %v1133_v32  ;;  %v1389_v28 = vshra.s32 %v3000_v41, 16  ;;  %v1405_v53 = vshra.s32 %v3009_v35, 16  ;;  %vm1178_vm7 = vcmp.lt.s32.totalorder %v1058_v31, %v1059_v48  ;;  %4276 = vst [vmem:[#allocation54_spill] sm:$0xff] %v3134_v13 }
 0x1e1   : > { %1889 = vst.msk [vmem:[#allocation2 + $0x20] sm:$0xff] %vm1788_vm2, %v1857_v58  ;;  %v3005_v27 = vpop.xlane.xlu0 %948  ;;  %v3007_v16 = vpop.xlane.xlu1 %903  ;;  %v3039_v58 = vld [vmem:[#allocation2 + $0x30] sm:$0xff]  ;;  %v3048_v61 = vsel %vm1178_vm7, %v1058_v31, %v1059_v48 }
 0x1e2   : > { %4262 = vst [vmem:[#allocation40_spill] sm:$0xff] %v3005_v27  ;;  %4263 = vst [vmem:[#allocation41_spill] sm:$0xff] %v3007_v16  ;;  %vm1026_vm1 = vcmp.eq.f32.partialorder %v2650_v23, %v3005_v27  ;;  %v1873_v20 = vmin.f32 %v3005_v27, %v2992_v55  ;;  %1136 = vmin.xlane.f32.xlu1 %v3022_v29  ;;  %v1858_v6 = vmin.f32 %v3007_v16, %v2998_v39  ;;  %v3082_v48 = vld [vmem:[#allocation2 + $0xb0] sm:$0xff] }
 0x1e3   : > { %4264 = vst [vmem:[#allocation42_spill] sm:$0xff] %v3022_v29  ;;  %4266 = vst [vmem:[#allocation44_spill] sm:$0xff] %v3039_v58  ;;  %vm1027_vm15 = vcmp.eq.f32.partialorder %v2653_v25, %v3005_v27  ;;  %v1056_v39 = vsel %vm992_vm8, %v2836_v11, 1073741824  ;;  %v1057_v29 = vsel %vm993_vm13, %v2841_v19, 1073741824  ;;  %v3059_v41 = vcvt.s32.f32 %v1405_v53 }
 0x1e4   : > { %1905 = vst.msk [vmem:[#allocation2 + $0xa0] sm:$0xff] %vm1788_vm2, %v1873_v20  ;;  %1890 = vst.msk [vmem:[#allocation2 + $0x28] sm:$0xff] %vm1788_vm2, %v1858_v6  ;;  %v3061_v20 = vcvt.s32.f32 %v1389_v28  ;;  %v1090_v3 = vsel %vm1026_vm1, %v2836_v11, 1073741824  ;;  %vm1024_vm8 = vcmp.eq.f32.partialorder %v2629_v4, %v2968_v43  ;;  %vm1025_vm13 = vcmp.eq.f32.partialorder %v2635_v7, %v2968_v43 }
 0x1e5   : > { %v3044_v32 = vpop.xlane.xlu1 %951  ;;  %v3046_v55 = vpop.xlane.xlu0 %906  ;;  %1408 = vmin.xlane.f32.xlu0 %v3059_v41  ;;  %v1181_v31 = vshra.s32 %v3048_v61, 16  ;;  %vm1162_vm1 = vcmp.lt.s32.totalorder %v1056_v39, %v1057_v29  ;;  %4269 = vst [vmem:[#allocation47_spill] sm:$0xff] %v3082_v48  ;;  %v1091_v28 = vsel %vm1027_vm15, %v2841_v19, 1073741824  ;;  %v1088_v27 = vsel %vm1024_vm8, %v2836_v11, 1073741824 }
 0x1e6   : > { %4267 = vst [vmem:[#allocation45_spill] sm:$0xff] %v3044_v32  ;;  %4268 = vst [vmem:[#allocation46_spill] sm:$0xff] %v3046_v55  ;;  %v1874_v5 = vmin.f32 %v3044_v32, %v3033_v22  ;;  %1392 = vmin.xlane.f32.xlu1 %v3061_v20  ;;  %v1859_v23 = vmin.f32 %v3046_v55, %v3039_v58  ;;  %vm998_vm7 = vcmp.eq.f32.partialorder %v2674_v60, %v3046_v55  ;;  %v3097_v22 = vld [vmem:[#allocation2 + $0x38] sm:$0xff] }
 0x1e7   : > { %vm999_vm3 = vcmp.eq.f32.partialorder %v2679_v62, %v3046_v55  ;;  %v3093_v6 = vsel %vm1162_vm1, %v1056_v39, %v1057_v29  ;;  %4271 = vst [vmem:[#allocation49_spill] sm:$0xff] %v3097_v22  ;;  %vm1434_vm14 = vcmp.lt.s32.totalorder %v1090_v3, %v1091_v28  ;;  %v3102_v25 = vcvt.s32.f32 %v1181_v31  ;;  %v3187_v55 = vld [vmem:[#allocation2 + $0x48] sm:$0xff] }
 0x1e8   : > { %1906 = vst.msk [vmem:[#allocation2 + $0xa8] sm:$0xff] %vm1788_vm2, %v1874_v5  ;;  %1891 = vst.msk [vmem:[#allocation2 + $0x30] sm:$0xff] %vm1788_vm2, %v1859_v23  ;;  %v1165_v5 = vshra.s32 %v3093_v6, 16  ;;  %v1089_v39 = vsel %vm1025_vm13, %v2841_v19, 1073741824  ;;  %vm996_vm15 = vcmp.eq.f32.partialorder %v2658_v38, %v3007_v16  ;;  %v3119_v23 = vld [vmem:[#allocation2 + $0xb8] sm:$0xff]  ;;  %v3128_v31 = vsel %vm1434_vm14, %v1090_v3, %v1091_v28 }
 0x1e9   : > { %v3095_v53 = vpop.xlane.xlu0 %954  ;;  %v3099_v58 = vpop.xlane.xlu1 %909  ;;  %4273 = vst [vmem:[#allocation51_spill] sm:$0xff] %v3102_v25  ;;  %4274 = vst [vmem:[#allocation52_spill] sm:$0xff] %v3119_v23  ;;  %1184 = vmin.xlane.f32.xlu0 %v3102_v25  ;;  %v1437_v43 = vshra.s32 %v3128_v31, 16  ;;  %vm1418_vm13 = vcmp.lt.s32.totalorder %v1088_v27, %v1089_v39  ;;  %v1063_v3 = vsel %vm999_vm3, %v2841_v19, 1073741824  ;;  %vm997_vm14 = vcmp.eq.f32.partialorder %v2664_v44, %v3007_v16 }
 0x1ea   : > { %4270 = vst [vmem:[#allocation48_spill] sm:$0xff] %v3095_v53  ;;  %4272 = vst [vmem:[#allocation50_spill] sm:$0xff] %v3099_v58  ;;  %v1875_v29 = vmin.f32 %v3095_v53, %v3082_v48  ;;  %v3122_v4 = vcvt.s32.f32 %v1165_v5  ;;  %v1860_v7 = vmin.f32 %v3099_v58, %v3097_v22  ;;  %v1062_v5 = vsel %vm998_vm7, %v2836_v11, 1073741824 }
 0x1eb   : > { %vm1028_vm8 = vcmp.eq.f32.partialorder %v2661_v42, %v3044_v32  ;;  %v3152_v28 = vsel %vm1418_vm13, %v1088_v27, %v1089_v39  ;;  %vm1029_vm1 = vcmp.eq.f32.partialorder %v2667_v46, %v3044_v32  ;;  %v3158_v60 = vcvt.s32.f32 %v1437_v43  ;;  %v3169_v39 = vld [vmem:[#allocation2 + $0xc0] sm:$0xff]  ;;  %4280 = vst [vmem:[#allocation58_spill] sm:$0xff] %v3187_v55 }
 0x1ec   : > { %1907 = vst.msk [vmem:[#allocation2 + $0xb0] sm:$0xff] %vm1788_vm2, %v1875_v29  ;;  %1168 = vmin.xlane.f32.xlu1 %v3122_v4  ;;  %1892 = vst.msk [vmem:[#allocation2 + $0x38] sm:$0xff] %vm1788_vm2, %v1860_v7  ;;  %v1421_v62 = vshra.s32 %v3152_v28, 16  ;;  %vm1030_vm3 = vcmp.eq.f32.partialorder %v2682_v63, %v3095_v53  ;;  %vm1210_vm7 = vcmp.lt.s32.totalorder %v1062_v5, %v1063_v3  ;;  %v1061_v22 = vsel %vm997_vm14, %v2841_v19, 1073741824 }
 0x1ed   : > { %v3132_v48 = vpop.xlane.xlu1 %957  ;;  %v3136_v25 = vpop.xlane.xlu0 %912  ;;  %4278 = vst [vmem:[#allocation56_spill] sm:$0xff] %v3169_v39  ;;  %1440 = vmin.xlane.f32.xlu0 %v3158_v60  ;;  %v3175_v7 = vsel %vm1210_vm7, %v1062_v5, %v1063_v3  ;;  %vm1031_vm7 = vcmp.eq.f32.partialorder %v2685_v1, %v3095_v53  ;;  %vm1000_vm13 = vcmp.eq.f32.partialorder %v2690_v15, %v3099_v58  ;;  %v1093_v1 = vsel %vm1029_vm1, %v2841_v19, 1073741824 }
 0x1ee   : > { %4275 = vst [vmem:[#allocation53_spill] sm:$0xff] %v3132_v48  ;;  %4277 = vst [vmem:[#allocation55_spill] sm:$0xff] %v3136_v25  ;;  %v1876_v29 = vmin.f32 %v3132_v48, %v3119_v23  ;;  %v1861_v27 = vmin.f32 %v3136_v25, %v3134_v13  ;;  %v3172_v43 = vcvt.s32.f32 %v1421_v62  ;;  %v1060_v23 = vsel %vm996_vm15, %v2836_v11, 1073741824 }
 0x1ef   : > { %v1213_v38 = vshra.s32 %v3175_v7, 16  ;;  %vm1194_vm15 = vcmp.lt.s32.totalorder %v1060_v23, %v1061_v22  ;;  %vm1001_vm14 = vcmp.eq.f32.partialorder %v2696_v18, %v3099_v58  ;;  %vm1032_vm6 = vcmp.eq.f32.partialorder %v2693_v17, %v3132_v48 }
 0x1f0   : > { %1908 = vst.msk [vmem:[#allocation2 + $0xb8] sm:$0xff] %vm1788_vm2, %v1876_v29  ;;  %1893 = vst.msk [vmem:[#allocation2 + $0x40] sm:$0xff] %vm1788_vm2, %v1861_v27  ;;  %1424 = vmin.xlane.f32.xlu1 %v3172_v43  ;;  %v3200_v44 = vsel %vm1194_vm15, %v1060_v23, %v1061_v22  ;;  %v3213_v27 = vld [vmem:[#allocation2 + $0xc8] sm:$0xff]  ;;  %v1094_v23 = vsel %vm1030_vm3, %v2836_v11, 1073741824  ;;  %vm1002_vm15 = vcmp.eq.f32.partialorder %v2706_v47, %v3136_v25  ;;  %v1065_v47 = vsel %vm1001_vm14, %v2841_v19, 1073741824 }
 0x1f1   : > { %v3185_v13 = vpop.xlane.xlu0 %960  ;;  %v3189_v62 = vpop.xlane.xlu1 %915  ;;  %v3208_v3 = vcvt.s32.f32 %v1213_v38  ;;  %v1197_v29 = vshra.s32 %v3200_v44, 16  ;;  %4282 = vst [vmem:[#allocation60_spill] sm:$0xff] %v3213_v27  ;;  %v1095_v38 = vsel %vm1031_vm7, %v2841_v19, 1073741824  ;;  %vm1033_vm11 = vcmp.eq.f32.partialorder %v2699_v24, %v3132_v48 }
 0x1f2   : > { %4279 = vst [vmem:[#allocation57_spill] sm:$0xff] %v3185_v13  ;;  %4281 = vst [vmem:[#allocation59_spill] sm:$0xff] %v3189_v62  ;;  %v1877_v5 = vmin.f32 %v3185_v13, %v3169_v39  ;;  %v1862_v22 = vmin.f32 %v3189_v62, %v3187_v55  ;;  %v1092_v39 = vsel %vm1028_vm8, %v2836_v11, 1073741824  ;;  %vm1466_vm3 = vcmp.lt.s32.totalorder %v1094_v23, %v1095_v38  ;;  %v3243_v55 = vld [vmem:[#allocation2 + $0x50] sm:$0xff] }
 0x1f3   : > { %1216 = vmin.xlane.f32.xlu0 %v3208_v3  ;;  %v3237_v63 = vcvt.s32.f32 %v1197_v29  ;;  %4285 = vst [vmem:[#allocation63_spill] sm:$0xff] %v3243_v55  ;;  %vm1003_vm8 = vcmp.eq.f32.partialorder %v2711_v49, %v3136_v25  ;;  %v3248_v42 = vsel %vm1466_vm3, %v1094_v23, %v1095_v38  ;;  %vm1450_vm7 = vcmp.lt.s32.totalorder %v1092_v39, %v1093_v1  ;;  %v3267_v38 = vld [vmem:[#allocation2 + $0xd0] sm:$0xff]  ;;  %v3297_v49 = vld [vmem:[#allocation2 + $0x58] sm:$0xff] }
 0x1f4   : > { %1909 = vst.msk [vmem:[#allocation2 + $0xc0] sm:$0xff] %vm1788_vm2, %v1877_v5  ;;  %1894 = vst.msk [vmem:[#allocation2 + $0x48] sm:$0xff] %vm1788_vm2, %v1862_v22  ;;  %v1469_v46 = vshra.s32 %v3248_v42, 16  ;;  %v3256_v29 = vsel %vm1450_vm7, %v1092_v39, %v1093_v1  ;;  %vm1034_vm1 = vcmp.eq.f32.partialorder %v2714_v50, %v3185_v13  ;;  %vm1035_vm7 = vcmp.eq.f32.partialorder %v2717_v52, %v3185_v13  ;;  %v3353_v52 = vld [vmem:[#allocation2 + $0x60] sm:$0xff] }
 0x1f5   : > { %v3230_v16 = vpop.xlane.xlu1 %963  ;;  %v3232_v5 = vpop.xlane.xlu0 %918  ;;  %1200 = vmin.xlane.f32.xlu1 %v3237_v63  ;;  %4286 = vst [vmem:[#allocation64_spill] sm:$0xff] %v3256_v29  ;;  %v1453_v22 = vshra.s32 %v3256_v29, 16  ;;  %4287 = vst [vmem:[#allocation65_spill] sm:$0xff] %v3267_v38  ;;  %v1064_v29 = vsel %vm1000_vm13, %v2836_v11, 1073741824  ;;  %vm1005_vm3 = vcmp.eq.f32.partialorder %v2728_v12, %v3189_v62  ;;  %v1099_v25 = vsel %vm1035_vm7, %v2841_v19, 1073741824  ;;  %v4307_v12 = vld [vmem:[#allocation10_spill] sm:$0xff] }
 0x1f6   : > { %4283 = vst [vmem:[#allocation61_spill] sm:$0xff] %v3230_v16  ;;  %4284 = vst [vmem:[#allocation62_spill] sm:$0xff] %v3232_v5  ;;  %v1878_v32 = vmin.f32 %v3230_v16, %v3213_v27  ;;  %v1863_v23 = vmin.f32 %v3232_v5, %v3243_v55  ;;  %v3273_v1 = vcvt.s32.f32 %v1469_v46  ;;  %v1066_v27 = vsel %vm1002_vm15, %v2836_v11, 1073741824 }
 0x1f7   : > { %v1067_v55 = vsel %vm1003_vm8, %v2841_v19, 1073741824  ;;  %v3290_v46 = vcvt.s32.f32 %v1453_v22  ;;  %4290 = vst [vmem:[#allocation68_spill] sm:$0xff] %v3297_v49  ;;  %vm1004_vm15 = vcmp.eq.f32.partialorder %v2722_v9, %v3189_v62  ;;  %vm1226_vm13 = vcmp.lt.s32.totalorder %v1064_v29, %v1065_v47  ;;  %4295 = vst [vmem:[#allocation73_spill] sm:$0xff] %v3353_v52 }
 0x1f8   : > { %1910 = vst.msk [vmem:[#allocation2 + $0xc8] sm:$0xff] %vm1788_vm2, %v1878_v32  ;;  %1895 = vst.msk [vmem:[#allocation2 + $0x50] sm:$0xff] %vm1788_vm2, %v1863_v23  ;;  %vm1242_vm9 = vcmp.lt.s32.totalorder %v1066_v27, %v1067_v55  ;;  %1472 = vmin.xlane.f32.xlu0 %v3273_v1  ;;  %v3310_v32 = vsel %vm1226_vm13, %v1064_v29, %v1065_v47  ;;  %v3325_v29 = vld [vmem:[#allocation2 + $0xd8] sm:$0xff]  ;;  %vm1037_vm13 = vcmp.eq.f32.partialorder %v2731_v14, %v3230_v16 }
 0x1f9   : > { %v3269_v53 = vpop.xlane.xlu0 %966  ;;  %v3271_v39 = vpop.xlane.xlu1 %921  ;;  %v3302_v15 = vsel %vm1242_vm9, %v1066_v27, %v1067_v55  ;;  %1456 = vmin.xlane.f32.xlu1 %v3290_v46  ;;  %vm1036_vm9 = vcmp.eq.f32.partialorder %v2725_v10, %v3230_v16  ;;  %v1229_v27 = vshra.s32 %v3310_v32, 16  ;;  %4292 = vst [vmem:[#allocation70_spill] sm:$0xff] %v3325_v29  ;;  %vm1006_vm14 = vcmp.eq.f32.partialorder %v2738_v45, %v3232_v5  ;;  %v4317_v10 = vld [vmem:[#allocation13_spill] sm:$0xff] }
 0x1fa   : > { %4288 = vst [vmem:[#allocation66_spill] sm:$0xff] %v3269_v53  ;;  %4289 = vst [vmem:[#allocation67_spill] sm:$0xff] %v3271_v39  ;;  %v1245_v18 = vshra.s32 %v3302_v15, 16  ;;  %v1879_v22 = vmin.f32 %v3269_v53, %v3267_v38  ;;  %v1864_v58 = vmin.f32 %v3271_v39, %v3297_v49  ;;  %v1098_v38 = vsel %vm1034_vm1, %v2836_v11, 1073741824 }
 0x1fb   : > { %v1096_v49 = vsel %vm1032_vm6, %v2836_v11, 1073741824  ;;  %vm1498_vm8 = vcmp.lt.s32.totalorder %v1098_v38, %v1099_v25  ;;  %v1097_v50 = vsel %vm1033_vm11, %v2841_v19, 1073741824  ;;  %vm1007_vm1 = vcmp.eq.f32.partialorder %v2743_v51, %v3232_v5  ;;  %v3407_v51 = vld [vmem:[#allocation2 + $0x68] sm:$0xff] }
 0x1fc   : > { %v3329_v47 = vcvt.s32.f32 %v1245_v18  ;;  %1911 = vst.msk [vmem:[#allocation2 + $0xd0] sm:$0xff] %vm1788_vm2, %v1879_v22  ;;  %v3346_v18 = vcvt.s32.f32 %v1229_v27  ;;  %1896 = vst.msk [vmem:[#allocation2 + $0x58] sm:$0xff] %vm1788_vm2, %v1864_v58  ;;  %v3358_v17 = vsel %vm1498_vm8, %v1098_v38, %v1099_v25  ;;  %vm1482_vm6 = vcmp.lt.s32.totalorder %v1096_v49, %v1097_v50  ;;  %v4298_v38 = vld [vmem:[#allocation5_spill] sm:$0xff] }
 0x1fd   : > { %v3314_v23 = vpop.xlane.xlu1 %969  ;;  %v3316_v55 = vpop.xlane.xlu0 %924  ;;  %4296 = vst [vmem:[#allocation74_spill] sm:$0xff] %v3358_v17  ;;  %vm1038_vm11 = vcmp.eq.f32.partialorder %v2746_v54, %v3269_v53  ;;  %v1501_v24 = vshra.s32 %v3358_v17, 16  ;;  %v3370_v27 = vsel %vm1482_vm6, %v1096_v49, %v1097_v50  ;;  %vm1039_vm8 = vcmp.eq.f32.partialorder %v4298_v38, %v3269_v53  ;;  %4303 = vst [vmem:[#allocation77_spill] sm:$0xff] %v3407_v51  ;;  %v4318_v38 = vld [vmem:[#allocation14_spill] sm:$0xff] }
 0x1fe   : > { %4291 = vst [vmem:[#allocation69_spill] sm:$0xff] %v3316_v55  ;;  %4293 = vst [vmem:[#allocation71_spill] sm:$0xff] %v3329_v47  ;;  %1248 = vmin.xlane.f32.xlu0 %v3329_v47  ;;  %1232 = vmin.xlane.f32.xlu1 %v3346_v18  ;;  %v1880_v25 = vmin.f32 %v3314_v23, %v3325_v29  ;;  %v1485_v48 = vshra.s32 %v3370_v27, 16  ;;  %v1865_v13 = vmin.f32 %v3316_v55, %v3353_v52 }
 0x1ff   : > { %4294 = vst [vmem:[#allocation72_spill] sm:$0xff] %v3346_v18  ;;  %4297 = vst [vmem:[#allocation75_spill] sm:$0xff] %v3370_v27  ;;  %v3381_v18 = vld [vmem:[#allocation2 + $0xe0] sm:$0xff]  ;;  %v3383_v47 = vcvt.s32.f32 %v1501_v24  ;;  %v1070_v49 = vsel %vm1006_vm14, %v2836_v11, 1073741824  ;;  %v1071_v50 = vsel %vm1007_vm1, %v2841_v19, 1073741824  ;;  %v1068_v29 = vsel %vm1004_vm15, %v2836_v11, 1073741824 }
 0x200   : > { %4299 = vst [vmem:[#allocation5_spill] sm:$0xff] %v3381_v18  ;;  %1912 = vst.msk [vmem:[#allocation2 + $0xd8] sm:$0xff] %vm1788_vm2, %v1880_v25  ;;  %v4301_v24 = vld [vmem:[#allocation6_spill] sm:$0xff]  ;;  %v3400_v52 = vcvt.s32.f32 %v1485_v48  ;;  %vm1274_vm7 = vcmp.lt.s32.totalorder %v1070_v49, %v1071_v50  ;;  %v1069_v45 = vsel %vm1005_vm3, %v2841_v19, 1073741824  ;;  %v4304_v25 = vld [vmem:[#allocation8_spill] sm:$0xff]  ;;  %vm1010_vm3 = vcmp.eq.f32.partialorder %v4307_v12, %v3316_v55 }
 0x201   : > { %v3362_v58 = vpop.xlane.xlu0 %972  ;;  %v3364_v22 = vpop.xlane.xlu1 %927  ;;  %4300 = vst [vmem:[#allocation76_spill] sm:$0xff] %v3383_v47  ;;  %vm1008_vm6 = vcmp.eq.f32.partialorder %v4301_v24, %v3271_v39  ;;  %1897 = vst.msk [vmem:[#allocation2 + $0x60] sm:$0xff] %vm1788_vm2, %v1865_v13  ;;  %vm1009_vm14 = vcmp.eq.f32.partialorder %v4304_v25, %v3271_v39  ;;  %v3412_v9 = vsel %vm1274_vm7, %v1070_v49, %v1071_v50  ;;  %v4309_v50 = vld [vmem:[#allocation7_spill] sm:$0xff]  ;;  %v1103_v27 = vsel %vm1039_vm8, %v2841_v19, 1073741824  ;;  %v3521_v24 = vld [vmem:[#allocation2 + $0x78] sm:$0xff] }
 0x202   : > { %4302 = vst [vmem:[#allocation6_spill] sm:$0xff] %v3400_v52  ;;  %1504 = vmin.xlane.f32.xlu0 %v3383_v47  ;;  %4305 = vst [vmem:[#allocation8_spill] sm:$0xff] %v3412_v9  ;;  %vm1258_vm15 = vcmp.lt.s32.totalorder %v1068_v29, %v1069_v45  ;;  %1488 = vmin.xlane.f32.xlu1 %v3400_v52  ;;  %v1277_v48 = vshra.s32 %v3412_v9, 16  ;;  %v1881_v5 = vmin.f32 %v3362_v58, %v3381_v18  ;;  %v4310_v47 = vld [vmem:[#allocation11_spill] sm:$0xff]  ;;  %v4312_v18 = vld [vmem:[#allocation9_spill] sm:$0xff] }
 0x203   : > { %v3422_v62 = vsel %vm1258_vm15, %v1068_v29, %v1069_v45  ;;  %vm1040_vm7 = vcmp.eq.f32.partialorder %v4309_v50, %v3314_v23  ;;  %vm1011_vm1 = vcmp.eq.f32.partialorder %v4310_v47, %v3316_v55  ;;  %v1866_v29 = vmin.f32 %v3364_v22, %v3407_v51  ;;  %v3437_v45 = vld [vmem:[#allocation2 + $0xe8] sm:$0xff]  ;;  %v4325_v12 = vld [vmem:[#allocation17_spill] sm:$0xff] }
 0x204   : > { %4308 = vst [vmem:[#allocation10_spill] sm:$0xff] %v3422_v62  ;;  %v1261_v52 = vshra.s32 %v3422_v62, 16  ;;  %4311 = vst [vmem:[#allocation7_spill] sm:$0xff] %v3437_v45  ;;  %vm1041_vm15 = vcmp.eq.f32.partialorder %v4312_v18, %v3314_v23  ;;  %v3441_v9 = vcvt.s32.f32 %v1277_v48  ;;  %v1102_v62 = vsel %vm1038_vm11, %v2836_v11, 1073741824  ;;  %v4315_v48 = vld [vmem:[#allocation12_spill] sm:$0xff] }
 0x205   : > { %v3416_v13 = vpop.xlane.xlu1 %975  ;;  %v3426_v49 = vpop.xlane.xlu0 %930  ;;  %1913 = vst.msk [vmem:[#allocation2 + $0xe0] sm:$0xff] %vm1788_vm2, %v1881_v5  ;;  %v1100_v51 = vsel %vm1036_vm9, %v2836_v11, 1073741824  ;;  %vm1042_vm10 = vcmp.eq.f32.partialorder %v4315_v48, %v3362_v58  ;;  %1898 = vst.msk [vmem:[#allocation2 + $0x68] sm:$0xff] %vm1788_vm2, %v1866_v29  ;;  %vm1530_vm0 = vcmp.lt.s32.totalorder %v1102_v62, %v1103_v27  ;;  %v1101_v54 = vsel %vm1037_vm13, %v2841_v19, 1073741824  ;;  %v3465_v5 = vld [vmem:[#allocation2 + $0x70] sm:$0xff] }
 0x206   : > { %4306 = vst [vmem:[#allocation78_spill] sm:$0xff] %v3416_v13  ;;  %4313 = vst [vmem:[#allocation11_spill] sm:$0xff] %v3441_v9  ;;  %v3456_v17 = vcvt.s32.f32 %v1261_v52  ;;  %1280 = vmin.xlane.f32.xlu0 %v3441_v9  ;;  %vm1043_vm9 = vcmp.eq.f32.partialorder %v4317_v10, %v3362_v58  ;;  %v3470_v52 = vsel %vm1530_vm0, %v1102_v62, %v1103_v27  ;;  %v4321_v62 = vld [vmem:[#allocation16_spill] sm:$0xff]  ;;  %v1073_v47 = vsel %vm1009_vm14, %v2841_v19, 1073741824 }
 0x207   : > { %4316 = vst [vmem:[#allocation12_spill] sm:$0xff] %v3465_v5  ;;  %vm1514_vm11 = vcmp.lt.s32.totalorder %v1100_v51, %v1101_v54  ;;  %vm1012_vm4 = vcmp.eq.f32.partialorder %v4318_v38, %v3364_v22  ;;  %v1533_v14 = vshra.s32 %v3470_v52, 16  ;;  %v1882_v16 = vmin.f32 %v3416_v13, %v3437_v45 }
 0x208   : > { %4314 = vst [vmem:[#allocation9_spill] sm:$0xff] %v3456_v17  ;;  %1264 = vmin.xlane.f32.xlu1 %v3456_v17  ;;  %v3478_v29 = vsel %vm1514_vm11, %v1100_v51, %v1101_v54  ;;  %vm1013_vm0 = vcmp.eq.f32.partialorder %v4321_v62, %v3364_v22  ;;  %v1867_v17 = vmin.f32 %v3426_v49, %v3465_v5  ;;  %v1074_v54 = vsel %vm1010_vm3, %v2836_v11, 1073741824 }
 0x209   : > { %4319 = vst [vmem:[#allocation13_spill] sm:$0xff] %v3478_v29  ;;  %v3482_v53 = vpop.xlane.xlu1 %933  ;;  %v1517_v27 = vshra.s32 %v3478_v29, 16  ;;  %v3491_v9 = vpop.xlane.xlu0 %978  ;;  %v3493_v51 = vcvt.s32.f32 %v1533_v14  ;;  %1914 = vst.msk [vmem:[#allocation2 + $0xe8] sm:$0xff] %vm1788_vm2, %v1882_v16  ;;  %v1075_v45 = vsel %vm1011_vm1, %v2841_v19, 1073741824  ;;  %v1072_v5 = vsel %vm1008_vm6, %v2836_v11, 1073741824  ;;  %v3508_v29 = vld [vmem:[#allocation2 + $0xf0] sm:$0xff] }
 0x20a   : > { %4320 = vst [vmem:[#allocation14_spill] sm:$0xff] %v3482_v53  ;;  %4322 = vst [vmem:[#allocation16_spill] sm:$0xff] %v3508_v29  ;;  %v4323_v16 = vld [vmem:[#allocation15_spill] sm:$0xff]  ;;  %vm1014_vm3 = vcmp.eq.f32.partialorder %v2802_v21, %v3426_v49  ;;  %vm1306_vm8 = vcmp.lt.s32.totalorder %v1074_v54, %v1075_v45  ;;  %vm1045_vm6 = vcmp.eq.f32.partialorder %v4325_v12, %v3416_v13 }
 0x20b   : > { %v3510_v14 = vcvt.s32.f32 %v1517_v27  ;;  %vm1044_vm11 = vcmp.eq.f32.partialorder %v4323_v16, %v3416_v13  ;;  %1899 = vst.msk [vmem:[#allocation2 + $0x70] sm:$0xff] %vm1788_vm2, %v1867_v17  ;;  %4324 = vst [vmem:[#allocation15_spill] sm:$0xff] %v3521_v24  ;;  %1536 = vmin.xlane.f32.xlu0 %v3493_v51  ;;  %vm1015_vm1 = vcmp.eq.f32.partialorder %v2807_v8, %v3426_v49  ;;  %v1078_v10 = vsel %vm1014_vm3, %v2836_v11, 1073741824 }
 0x20c   : > { %v3528_v27 = vsel %vm1306_vm8, %v1074_v54, %v1075_v45  ;;  %vm1290_vm13 = vcmp.lt.s32.totalorder %v1072_v5, %v1073_v47  ;;  %vm1046_vm12 = vcmp.eq.f32.partialorder %v2810_v36, %v3491_v9  ;;  %vm1047_vm14 = vcmp.eq.f32.partialorder %v2813_v33, %v3491_v9 }
 0x20d   : > { %1520 = vmin.xlane.f32.xlu1 %v3510_v14  ;;  %v1309_v17 = vshra.s32 %v3528_v27, 16  ;;  %v3534_v25 = vsel %vm1290_vm13, %v1072_v5, %v1073_v47  ;;  %v1883_v39 = vmin.f32 %v3491_v9, %v3508_v29  ;;  %vm1016_vm8 = vcmp.eq.f32.partialorder %v2818_v37, %v3482_v53  ;;  %v3547_v54 = vpop.xlane.xlu1 %981 }
 0x20e   : > { %4326 = vst [vmem:[#allocation17_spill] sm:$0xff] %v3534_v25  ;;  %v1293_v55 = vshra.s32 %v3534_v25, 16  ;;  %v1868_v45 = vmin.f32 %v3482_v53, %v3521_v24  ;;  %4327 = vst [vmem:[#allocation79_spill] sm:$0xff] %v3547_v54  ;;  %v1106_v47 = vsel %vm1042_vm10, %v2836_v11, 1073741824  ;;  %v1107_v29 = vsel %vm1043_vm9, %v2841_v19, 1073741824  ;;  %v3564_v25 = vld [vmem:[#allocation2 + $0xf8] sm:$0xff] }
 0x20f   : > { %v3549_v5 = vcvt.s32.f32 %v1309_v17  ;;  %1915 = vst.msk [vmem:[#allocation2 + $0xf0] sm:$0xff] %vm1788_vm2, %v1883_v39  ;;  %v1104_v24 = vsel %vm1040_vm7, %v2836_v11, 1073741824  ;;  %4328 = vst [vmem:[#allocation80_spill] sm:$0xff] %v3564_v25  ;;  %vm1017_vm13 = vcmp.eq.f32.partialorder %v2824_v2, %v3482_v53  ;;  %vm1562_vm10 = vcmp.lt.s32.totalorder %v1106_v47, %v1107_v29 }
 0x210   : > { %v3566_v17 = vcvt.s32.f32 %v1293_v55  ;;  %1900 = vst.msk [vmem:[#allocation2 + $0x78] sm:$0xff] %vm1788_vm2, %v1868_v45  ;;  %v1105_v39 = vsel %vm1041_vm15, %v2841_v19, 1073741824  ;;  %v3576_v48 = vsel %vm1562_vm10, %v1106_v47, %v1107_v29  ;;  %vm1048_vm9 = vcmp.eq.f32.partialorder %v2821_v34, %v3547_v54 }
 0x211   : > { %1312 = vmin.xlane.f32.xlu0 %v3549_v5  ;;  %vm1546_vm7 = vcmp.lt.s32.totalorder %v1104_v24, %v1105_v39  ;;  %vm1049_vm5 = vcmp.eq.f32.partialorder %v2827_v57, %v3547_v54  ;;  %v1565_v55 = vshra.s32 %v3576_v48, 16  ;;  %v1884_v18 = vmin.f32 %v3547_v54, %v3564_v25 }
 0x212   : > { %1296 = vmin.xlane.f32.xlu1 %v3566_v17  ;;  %v3584_v50 = vsel %vm1546_vm7, %v1104_v24, %v1105_v39  ;;  %v1079_v45 = vsel %vm1015_vm1, %v2841_v19, 1073741824  ;;  %v1076_v24 = vsel %vm1012_vm4, %v2836_v11, 1073741824  ;;  %v1077_v47 = vsel %vm1013_vm0, %v2841_v19, 1073741824 }
 0x213   : > { %v1549_v29 = vshra.s32 %v3584_v50, 16  ;;  %v3605_v39 = vcvt.s32.f32 %v1565_v55  ;;  %1916 = vst.msk [vmem:[#allocation2 + $0xf8] sm:$0xff] %vm1788_vm2, %v1884_v18  ;;  %vm1338_vm15 = vcmp.lt.s32.totalorder %v1078_v10, %v1079_v45  ;;  %vm1322_vm3 = vcmp.lt.s32.totalorder %v1076_v24, %v1077_v47 }
 0x214   : > { %v1110_v21 = vsel %vm1046_vm12, %v2836_v11, 1073741824  ;;  %v3614_v38 = vsel %vm1338_vm15, %v1078_v10, %v1079_v45  ;;  %v3616_v25 = vsel %vm1322_vm3, %v1076_v24, %v1077_v47  ;;  %v1111_v62 = vsel %vm1047_vm14, %v2841_v19, 1073741824 }
 0x215   : > { %v3612_v8 = vcvt.s32.f32 %v1549_v29  ;;  %1568 = vmin.xlane.f32.xlu0 %v3605_v39  ;;  %v1341_v55 = vshra.s32 %v3614_v38, 16  ;;  %v1325_v18 = vshra.s32 %v3616_v25, 16  ;;  %vm1594_vm4 = vcmp.lt.s32.totalorder %v1110_v21, %v1111_v62 }
 0x216   : > { %v1108_v36 = vsel %vm1044_vm11, %v2836_v11, 1073741824  ;;  %v3630_v10 = vsel %vm1594_vm4, %v1110_v21, %v1111_v62  ;;  %v1109_v33 = vsel %vm1045_vm6, %v2841_v19, 1073741824  ;;  %v1080_v29 = vsel %vm1016_vm8, %v2836_v11, 1073741824 }
 0x217   : > { %1552 = vmin.xlane.f32.xlu1 %v3612_v8  ;;  %v1081_v16 = vsel %vm1017_vm13, %v2841_v19, 1073741824  ;;  %v3644_v45 = vcvt.s32.f32 %v1341_v55  ;;  %v3646_v24 = vcvt.s32.f32 %v1325_v18  ;;  %v1597_v47 = vshra.s32 %v3630_v10, 16 }
 0x218   : > { %vm1578_vm12 = vcmp.lt.s32.totalorder %v1108_v36, %v1109_v33  ;;  %vm1354_vm0 = vcmp.lt.s32.totalorder %v1080_v29, %v1081_v16  ;;  %v1112_v37 = vsel %vm1048_vm9, %v2836_v11, 1073741824  ;;  %v1113_v2 = vsel %vm1049_vm5, %v2841_v19, 1073741824 }
 0x219   : > { %v3649_v21 = vsel %vm1578_vm12, %v1108_v36, %v1109_v33  ;;  %1344 = vmin.xlane.f32.xlu0 %v3644_v45  ;;  %v3660_v12 = vcvt.s32.f32 %v1597_v47  ;;  %v3663_v55 = vsel %vm1354_vm0, %v1080_v29, %v1081_v16  ;;  %vm1610_vm11 = vcmp.lt.s32.totalorder %v1112_v37, %v1113_v2 }
 0x21a   : > { %v1581_v62 = vshra.s32 %v3649_v21, 16  ;;  %v1357_v34 = vshra.s32 %v3663_v55, 16  ;;  %v3670_v11 = vsel %vm1610_vm11, %v1112_v37, %v1113_v2  ;;  %v1116_v33 = vand.u32 65535, %v2864_v0  ;;  %v4329_v37 = vld [vmem:[#allocation29_spill] sm:$0xff] }
 0x21b   : > { %1328 = vmin.xlane.f32.xlu1 %v3646_v24  ;;  %v1613_v19 = vshra.s32 %v3670_v11, 16  ;;  %v1372_v47 = vand.u32 65535, %v2926_v59  ;;  %v1132_v0 = vand.u32 65535, %v2973_v26  ;;  %v1180_v13 = vand.u32 65535, %v3048_v61 }
 0x21c   : > { %v3666_v18 = vcvt.s32.f32 %v1581_v62  ;;  %v3673_v57 = vcvt.s32.f32 %v1357_v34  ;;  %v1118_v16 = vcvt.s32.f32 %v1116_v33  ;;  %v1436_v61 = vand.u32 65535, %v3128_v31 }
 0x21d   : > { %1600 = vmin.xlane.f32.xlu0 %v3660_v12  ;;  %v3677_v36 = vcvt.s32.f32 %v1613_v19  ;;  %v1374_v34 = vcvt.s32.f32 %v1372_v47  ;;  %v1148_v19 = vand.u32 65535, %v2964_v40  ;;  %v1404_v47 = vand.u32 65535, %v3009_v35  ;;  %v4330_v40 = vld [vmem:[#allocation39_spill] sm:$0xff] }
 0x21e   : > { %v1388_v53 = vand.u32 65535, %v4330_v40  ;;  %v1212_v31 = vand.u32 65535, %v3175_v7 }
 0x21f   : > { %1584 = vmin.xlane.f32.xlu1 %v3666_v18  ;;  %v1150_v59 = vcvt.s32.f32 %v1148_v19  ;;  %v1406_v19 = vcvt.s32.f32 %v1404_v47  ;;  %v4332_v47 = vld [vmem:[#allocation51_spill] sm:$0xff] }
 0x223   : > { %1360 = vmin.xlane.f32.xlu1 %v3673_v57 }
 0x227   : > { %1616 = vmin.xlane.f32.xlu1 %v3677_v36 }
 0x263   : > { %v3681_v29 = vpop.xlane.xlu0 %1120 }
 0x264   : > { %vm1122_vm5 = vcmp.eq.f32.partialorder %v4329_v37, %v3681_v29 }
 0x265   : > { %v1123_v2 = vsel %vm1122_vm5, %v1118_v16, inf }
 0x266   : > { %1124 = vmin.xlane.f32.xlu0 %v1123_v2  ;;  %v1134_v2 = vcvt.s32.f32 %v1132_v0 }
 0x269   : > { %v3686_v62 = vpop.xlane.xlu0 %1376 }
 0x26a   : > { %vm1378_vm6 = vcmp.eq.f32.partialorder %v2960_v56, %v3686_v62  ;;  %v4331_v56 = vld [vmem:[#allocation42_spill] sm:$0xff] }
 0x26b   : > { %v1379_v54 = vsel %vm1378_vm6, %v1374_v34, inf }
 0x26c   : > { %1380 = vmin.xlane.f32.xlu0 %v1379_v54 }
 0x26d   : > { %v3692_v33 = vpop.xlane.xlu0 %1152 }
 0x26e   : > { %vm1154_vm1 = vcmp.eq.f32.partialorder %v2995_v30, %v3692_v33  ;;  %v1390_v30 = vcvt.s32.f32 %v1388_v53 }
 0x26f   : > { %v3696_v16 = vpop.xlane.xlu1 %1136  ;;  %v1155_v37 = vsel %vm1154_vm1, %v1150_v59, inf  ;;  %v1164_v59 = vand.u32 65535, %v3093_v6 }
 0x270   : > { %1156 = vmin.xlane.f32.xlu0 %v1155_v37  ;;  %vm1138_vm14 = vcmp.eq.f32.partialorder %v4331_v56, %v3696_v16 }
 0x271   : > { %v1139_v26 = vsel %vm1138_vm14, %v1134_v2, inf  ;;  %v1182_v2 = vcvt.s32.f32 %v1180_v13  ;;  %v1166_v40 = vcvt.s32.f32 %v1164_v59  ;;  %v1438_v13 = vcvt.s32.f32 %v1436_v61 }
 0x272   : > { %1140 = vmin.xlane.f32.xlu1 %v1139_v26  ;;  %v3702_v54 = vpop.xlane.xlu0 %1408 }
 0x273   : > { %v3704_v34 = vpop.xlane.xlu1 %1392  ;;  %vm1410_vm8 = vcmp.eq.f32.partialorder %v3059_v41, %v3702_v54 }
 0x274   : > { %vm1394_vm13 = vcmp.eq.f32.partialorder %v3061_v20, %v3704_v34  ;;  %v1411_v35 = vsel %vm1410_vm8, %v1406_v19, inf  ;;  %v1420_v20 = vand.u32 65535, %v3152_v28 }
 0x275   : > { %v1395_v0 = vsel %vm1394_vm13, %v1390_v30, inf  ;;  %1412 = vmin.xlane.f32.xlu0 %v1411_v35 }
 0x276   : > { %1396 = vmin.xlane.f32.xlu1 %v1395_v0  ;;  %v3712_v37 = vpop.xlane.xlu0 %1184  ;;  %v1422_v30 = vcvt.s32.f32 %v1420_v20  ;;  %v1214_v0 = vcvt.s32.f32 %v1212_v31  ;;  %v1244_v20 = vand.u32 65535, %v3302_v15 }
 0x277   : > { %vm1186_vm10 = vcmp.eq.f32.partialorder %v4332_v47, %v3712_v37 }
 0x278   : > { %v1187_v41 = vsel %vm1186_vm10, %v1182_v2, inf  ;;  %v1468_v2 = vand.u32 65535, %v3248_v42  ;;  %v1246_v31 = vcvt.s32.f32 %v1244_v20 }
 0x279   : > { %v3717_v53 = vpop.xlane.xlu1 %1168  ;;  %1188 = vmin.xlane.f32.xlu0 %v1187_v41 }
 0x27a   : > { %vm1170_vm7 = vcmp.eq.f32.partialorder %v3122_v4, %v3717_v53  ;;  %v3722_v56 = vpop.xlane.xlu0 %1440  ;;  %v1196_v4 = vand.u32 65535, %v3200_v44  ;;  %v1470_v41 = vcvt.s32.f32 %v1468_v2 }
 0x27b   : > { %v1171_v6 = vsel %vm1170_vm7, %v1166_v40, inf  ;;  %vm1442_vm9 = vcmp.eq.f32.partialorder %v3158_v60, %v3722_v56 }
 0x27c   : > { %1172 = vmin.xlane.f32.xlu1 %v1171_v6  ;;  %v1443_v19 = vsel %vm1442_vm9, %v1438_v13, inf  ;;  %v1198_v59 = vcvt.s32.f32 %v1196_v4  ;;  %v4335_v4 = vld [vmem:[#allocation74_spill] sm:$0xff] }
 0x27d   : > { %v3727_v26 = vpop.xlane.xlu1 %1424  ;;  %1444 = vmin.xlane.f32.xlu0 %v1443_v19  ;;  %v1500_v15 = vand.u32 65535, %v4335_v4 }
 0x27e   : > { %vm1426_vm15 = vcmp.eq.f32.partialorder %v3172_v43, %v3727_v26  ;;  %v4333_v43 = vld [vmem:[#allocation64_spill] sm:$0xff] }
 0x27f   : > { %v1427_v28 = vsel %vm1426_vm15, %v1422_v30, inf  ;;  %v1452_v44 = vand.u32 65535, %v4333_v43  ;;  %v4334_v30 = vld [vmem:[#allocation71_spill] sm:$0xff]  ;;  %v1502_v2 = vcvt.s32.f32 %v1500_v15 }
 0x280   : > { %1428 = vmin.xlane.f32.xlu1 %v1427_v28  ;;  %v3732_v35 = vpop.xlane.xlu0 %1216  ;;  %v4342_v15 = vld [vmem:[#allocation11_spill] sm:$0xff] }
 0x281   : > { %vm1218_vm3 = vcmp.eq.f32.partialorder %v3208_v3, %v3732_v35  ;;  %v1454_v3 = vcvt.s32.f32 %v1452_v44  ;;  %v4338_v44 = vld [vmem:[#allocation76_spill] sm:$0xff] }
 0x282   : > { %v3736_v60 = vpop.xlane.xlu1 %1200  ;;  %v1219_v7 = vsel %vm1218_vm3, %v1214_v0, inf  ;;  %v4336_v0 = vld [vmem:[#allocation72_spill] sm:$0xff] }
 0x283   : > { %1220 = vmin.xlane.f32.xlu0 %v1219_v7  ;;  %vm1202_vm4 = vcmp.eq.f32.partialorder %v3237_v63, %v3736_v60  ;;  %v1228_v63 = vand.u32 65535, %v3310_v32 }
 0x284   : > { %v1203_v47 = vsel %vm1202_vm4, %v1198_v59, inf }
 0x285   : > { %1204 = vmin.xlane.f32.xlu1 %v1203_v47  ;;  %v3742_v61 = vpop.xlane.xlu0 %1472 }
 0x286   : > { %v3744_v40 = vpop.xlane.xlu1 %1456  ;;  %vm1474_vm12 = vcmp.eq.f32.partialorder %v3273_v1, %v3742_v61  ;;  %v1230_v1 = vcvt.s32.f32 %v1228_v63  ;;  %v4341_v63 = vld [vmem:[#allocation10_spill] sm:$0xff] }
 0x287   : > { %v1475_v42 = vsel %vm1474_vm12, %v1470_v41, inf  ;;  %vm1458_vm0 = vcmp.eq.f32.partialorder %v3290_v46, %v3744_v40  ;;  %v4337_v46 = vld [vmem:[#allocation75_spill] sm:$0xff]  ;;  %v4339_v41 = vld [vmem:[#allocation8_spill] sm:$0xff] }
 0x288   : > { %1476 = vmin.xlane.f32.xlu0 %v1475_v42  ;;  %v1459_v6 = vsel %vm1458_vm0, %v1454_v3, inf  ;;  %v1484_v32 = vand.u32 65535, %v4337_v46  ;;  %v1276_v3 = vand.u32 65535, %v4339_v41  ;;  %v4340_v42 = vld [vmem:[#allocation6_spill] sm:$0xff] }
 0x289   : > { %1460 = vmin.xlane.f32.xlu1 %v1459_v6  ;;  %v1260_v6 = vand.u32 65535, %v4341_v63  ;;  %v4345_v63 = vld [vmem:[#allocation17_spill] sm:$0xff] }
 0x28a   : > { %v1486_v47 = vcvt.s32.f32 %v1484_v32  ;;  %v4343_v32 = vld [vmem:[#allocation9_spill] sm:$0xff] }
 0x28b   : > { %v3752_v13 = vpop.xlane.xlu0 %1248  ;;  %v3754_v19 = vpop.xlane.xlu1 %1232 }
 0x28c   : > { %vm1250_vm11 = vcmp.eq.f32.partialorder %v4334_v30, %v3752_v13  ;;  %vm1234_vm5 = vcmp.eq.f32.partialorder %v4336_v0, %v3754_v19  ;;  %v1532_v0 = vand.u32 65535, %v3470_v52  ;;  %v1308_v52 = vand.u32 65535, %v3528_v27 }
 0x28d   : > { %v1251_v28 = vsel %vm1250_vm11, %v1246_v31, inf  ;;  %v1235_v7 = vsel %vm1234_vm5, %v1230_v1, inf  ;;  %v1278_v1 = vcvt.s32.f32 %v1276_v3  ;;  %v1564_v27 = vand.u32 65535, %v3576_v48 }
 0x28e   : > { %1252 = vmin.xlane.f32.xlu0 %v1251_v28  ;;  %1236 = vmin.xlane.f32.xlu1 %v1235_v7  ;;  %v1262_v28 = vcvt.s32.f32 %v1260_v6  ;;  %v4344_v7 = vld [vmem:[#allocation13_spill] sm:$0xff]  ;;  %v1534_v41 = vcvt.s32.f32 %v1532_v0  ;;  %v1292_v6 = vand.u32 65535, %v4345_v63  ;;  %v1324_v48 = vand.u32 65535, %v3616_v25 }
 0x28f   : > { %v3762_v59 = vpop.xlane.xlu0 %1504  ;;  %v3764_v43 = vpop.xlane.xlu1 %1488  ;;  %v1580_v25 = vand.u32 65535, %v3649_v21 }
 0x290   : > { %vm1506_vm6 = vcmp.eq.f32.partialorder %v4338_v44, %v3762_v59  ;;  %vm1490_vm1 = vcmp.eq.f32.partialorder %v4340_v42, %v3764_v43 }
 0x291   : > { %v1507_v20 = vsel %vm1506_vm6, %v1502_v2, inf  ;;  %v1491_v31 = vsel %vm1490_vm1, %v1486_v47, inf  ;;  %v1516_v2 = vand.u32 65535, %v4344_v7  ;;  %v1566_v7 = vcvt.s32.f32 %v1564_v27 }
 0x292   : > { %1508 = vmin.xlane.f32.xlu0 %v1507_v20  ;;  %1492 = vmin.xlane.f32.xlu1 %v1491_v31  ;;  %v1612_v27 = vand.u32 65535, %v3670_v11  ;;  %v1383_v11 = vcvt.f32.s32 %v3686_v62  ;;  %v1740_v62 = vld [vmem:[#allocation3 + $0x80] sm:$0xff] }
 0x293   : > { %v3772_v30 = vpop.xlane.xlu0 %1280  ;;  %v1518_v20 = vcvt.s32.f32 %v1516_v2  ;;  %v1340_v2 = vand.u32 65535, %v3614_v38  ;;  %v1596_v38 = vand.u32 65535, %v3630_v10  ;;  %v1582_v10 = vcvt.s32.f32 %v1580_v25  ;;  %v4347_v25 = vld [vmem:[#allocation18_spill] sm:$0xff] }
 0x294   : > { %vm1282_vm14 = vcmp.eq.f32.partialorder %v4342_v15, %v3772_v30  ;;  %v1310_v15 = vcvt.s32.f32 %v1308_v52 }
 0x295   : > { %v3774_v4 = vpop.xlane.xlu1 %1264  ;;  %v1283_v46 = vsel %vm1282_vm14, %v1278_v1, inf }
 0x296   : > { %vm1266_vm8 = vcmp.eq.f32.partialorder %v4343_v32, %v3774_v4  ;;  %1284 = vmin.xlane.f32.xlu0 %v1283_v46 }
 0x297   : > { %v1267_v44 = vsel %vm1266_vm8, %v1262_v28, inf }
 0x298   : > { %1268 = vmin.xlane.f32.xlu1 %v1267_v44  ;;  %v3782_v47 = vpop.xlane.xlu0 %1536 }
 0x299   : > { %vm1538_vm13 = vcmp.eq.f32.partialorder %v3493_v51, %v3782_v47  ;;  %v1294_v51 = vcvt.s32.f32 %v1292_v6  ;;  %v1598_v6 = vcvt.s32.f32 %v1596_v38 }
 0x29a   : > { %v3784_v3 = vpop.xlane.xlu1 %1520  ;;  %v1539_v42 = vsel %vm1538_vm13, %v1534_v41, inf }
 0x29b   : > { %vm1522_vm10 = vcmp.eq.f32.partialorder %v3510_v14, %v3784_v3  ;;  %1540 = vmin.xlane.f32.xlu0 %v1539_v42  ;;  %v1548_v14 = vand.u32 65535, %v3584_v50 }
 0x29c   : > { %v1523_v31 = vsel %vm1522_vm10, %v1518_v20, inf  ;;  %v1342_v20 = vcvt.s32.f32 %v1340_v2 }
 0x29d   : > { %1524 = vmin.xlane.f32.xlu1 %v1523_v31 }
 0x29e   : > { %v3792_v1 = vpop.xlane.xlu0 %1312 }
 0x29f   : > { %v3794_v28 = vpop.xlane.xlu1 %1296  ;;  %vm1314_vm7 = vcmp.eq.f32.partialorder %v3549_v5, %v3792_v1  ;;  %v1550_v5 = vcvt.s32.f32 %v1548_v14  ;;  %v1127_v14 = vcvt.f32.s32 %v3681_v29  ;;  %v4346_v29 = vld [vmem:[#allocation19_spill] sm:$0xff] }
 0x2a0   : > { %v1315_v0 = vsel %vm1314_vm7, %v1310_v15, inf  ;;  %vm1298_vm9 = vcmp.eq.f32.partialorder %v3566_v17, %v3794_v28  ;;  %vm4348_vm1 = vcmp.lt.f32.partialorder %v4346_v29, %v4347_v25  ;;  %v1175_v25 = vcvt.f32.s32 %v3717_v53 }
 0x2a1   : > { %1316 = vmin.xlane.f32.xlu0 %v1315_v0  ;;  %v1299_v46 = vsel %vm1298_vm9, %v1294_v51, inf }
 0x2a2   : > { %1300 = vmin.xlane.f32.xlu1 %v1299_v46  ;;  %v3802_v32 = vpop.xlane.xlu0 %1568  ;;  %v1176_v53 = vshll.u32 %v1175_v25, 16 }
 0x2a3   : > { %vm1570_vm15 = vcmp.eq.f32.partialorder %v3605_v39, %v3802_v32  ;;  %v1326_v39 = vcvt.s32.f32 %v1324_v48  ;;  %v1724_v48 = vld [vmem:[#allocation3] sm:$0xff] }
 0x2a4   : > { %v3805_v44 = vpop.xlane.xlu1 %1552  ;;  %v1571_v41 = vsel %vm1570_vm15, %v1566_v7, inf  ;;  %v1128_v7 = vshll.u32 %v1127_v14, 16 }
 0x2a5   : > { %vm1554_vm3 = vcmp.eq.f32.partialorder %v3612_v8, %v3805_v44  ;;  %1572 = vmin.xlane.f32.xlu0 %v1571_v41 }
 0x2a6   : > { %v1555_v17 = vsel %vm1554_vm3, %v1550_v5, inf  ;;  %v3812_v50 = vpop.xlane.xlu0 %1344  ;;  %v3843_v5 = vstv %s2127_s29 }
 0x2a7   : > { %1556 = vmin.xlane.f32.xlu1 %v1555_v17  ;;  %vm1346_vm4 = vcmp.eq.f32.partialorder %v3644_v45, %v3812_v50  ;;  %v1356_v45 = vand.u32 65535, %v3663_v55  ;;  %v1614_v55 = vcvt.s32.f32 %v1612_v27  ;;  %v1384_v17 = vshll.u32 %v1383_v11, 16 }
 0x2a8   : > { %v3815_v52 = vpop.xlane.xlu1 %1328  ;;  %v1347_v42 = vsel %vm1346_vm4, %v1342_v20, inf  ;;  %v1159_v20 = vcvt.f32.s32 %v3692_v33  ;;  %v1415_v33 = vcvt.f32.s32 %v3702_v54  ;;  %v1191_v54 = vcvt.f32.s32 %v3712_v37 }
 0x2a9   : > { %vm1330_vm12 = vcmp.eq.f32.partialorder %v3646_v24, %v3815_v52  ;;  %1348 = vmin.xlane.f32.xlu0 %v1347_v42  ;;  %v1358_v51 = vcvt.s32.f32 %v1356_v45 }
 0x2aa   : > { %v1331_v8 = vsel %vm1330_vm12, %v1326_v39, inf  ;;  %v3822_v63 = vpop.xlane.xlu0 %1600  ;;  %v1143_v39 = vcvt.f32.s32 %v3696_v16  ;;  %v4349_v16 = vld [vmem:[#allocation23_spill] sm:$0xff] }
 0x2ab   : > { %1332 = vmin.xlane.f32.xlu1 %v1331_v8  ;;  %vm1602_vm0 = vcmp.eq.f32.partialorder %v3660_v12, %v3822_v63 }
 0x2ac   : > { %v3824_v31 = vpop.xlane.xlu1 %1584  ;;  %v1603_v15 = vsel %vm1602_vm0, %v1598_v6, inf  ;;  %v1144_v27 = vshll.u32 %v1143_v39, 16 }
 0x2ad   : > { %vm1586_vm11 = vcmp.eq.f32.partialorder %v3666_v18, %v3824_v31  ;;  %1604 = vmin.xlane.f32.xlu0 %v1603_v15 }
 0x2ae   : > { %v1587_v24 = vsel %vm1586_vm11, %v1582_v10, inf  ;;  %v1160_v10 = vshll.u32 %v1159_v20, 16  ;;  %v4353_v20 = vld [vmem:[#allocation25_spill] sm:$0xff] }
 0x2af   : > { %1588 = vmin.xlane.f32.xlu1 %v1587_v24  ;;  %v1399_v24 = vcvt.f32.s32 %v3704_v34 }
 0x2b0   : > { %v3831_v21 = vpop.xlane.xlu1 %1360 }
 0x2b1   : > { %vm1362_vm5 = vcmp.eq.f32.partialorder %v3673_v57, %v3831_v21 }
 0x2b2   : > { %v1363_v12 = vsel %vm1362_vm5, %v1358_v51, inf }
 0x2b3   : > { %1364 = vmin.xlane.f32.xlu1 %v1363_v12  ;;  %v4350_v12 = vld [vmem:[#allocation21_spill] sm:$0xff] }
 0x2b4   : > { %v3836_v0 = vpop.xlane.xlu1 %1616  ;;  %vm4351_vm14 = vcmp.lt.f32.partialorder %v4349_v16, %v4350_v12  ;;  %v1447_v16 = vcvt.f32.s32 %v3722_v56 }
 0x2b5   : > { %vm1618_vm6 = vcmp.eq.f32.partialorder %v3677_v36, %v3836_v0 }
 0x2b6   : > { %v1619_v18 = vsel %vm1618_vm6, %v1614_v55, inf }
 0x2b7   : > { %1620 = vmin.xlane.f32.xlu1 %v1619_v18 }
 0x2f3   : > { %v1125_v46 = vpop.xlane.xlu0 %1124 }
 0x2f4   : > { %v1126_v2 = vcvt.f32.s32 %v1125_v46  ;;  %v1726_v46 = vld [vmem:[#allocation3 + $0x10] sm:$0xff] }
 0x2f6   : > { %v1129_v57 = vadd.s32 %v1128_v7, %v1126_v2  ;;  %v1416_v2 = vshll.u32 %v1415_v33, 16  ;;  %v1192_v33 = vshll.u32 %v1191_v54, 16  ;;  %v1431_v54 = vcvt.f32.s32 %v3727_v26 }
 0x2f8   : > { %v1628_v36 = vadd.s32 %v3843_v5, %v1129_v57  ;;  %v1400_v57 = vshll.u32 %v1399_v24, 16 }
 0x2f9   : > { %v1381_v41 = vpop.xlane.xlu0 %1380 }
 0x2fa   : > { %v1382_v38 = vcvt.f32.s32 %v1381_v41  ;;  %v1756_v42 = vsel %vm4348_vm1, %v1628_v36, %v1724_v48  ;;  %v1725_v48 = vld [vmem:[#allocation3 + $0x8] sm:$0xff] }
 0x2fb   : > { %1789 = vst.msk [vmem:[#allocation3] sm:$0xff] %vm1788_vm2, %v1756_v42  ;;  %v4355_v42 = vld [vmem:[#allocation26_spill] sm:$0xff] }
 0x2fc   : > { %v1385_v8 = vadd.s32 %v1384_v17, %v1382_v38  ;;  %v4352_v17 = vld [vmem:[#allocation27_spill] sm:$0xff] }
 0x2fd   : > { %v1157_v6 = vpop.xlane.xlu0 %1156  ;;  %vm4354_vm8 = vcmp.lt.f32.partialorder %v4352_v17, %v4353_v20  ;;  %v1448_v17 = vshll.u32 %v1447_v16, 16  ;;  %v1727_v20 = vld [vmem:[#allocation3 + $0x18] sm:$0xff] }
 0x2fe   : > { %v1644_v45 = vadd.s32 %v3843_v5, %v1385_v8  ;;  %v1158_v15 = vcvt.f32.s32 %v1157_v6  ;;  %v4356_v8 = vld [vmem:[#allocation24_spill] sm:$0xff] }
 0x2ff   : > { %v1141_v51 = vpop.xlane.xlu1 %1140  ;;  %vm4357_vm13 = vcmp.lt.f32.partialorder %v4355_v42, %v4356_v8  ;;  %v1432_v8 = vshll.u32 %v1431_v54, 16  ;;  %v4373_v54 = vld [vmem:[#allocation35_spill] sm:$0xff] }
 0x300   : > { %v1772_v55 = vsel %vm4351_vm14, %v1644_v45, %v1740_v62  ;;  %v1161_v18 = vadd.s32 %v1160_v10, %v1158_v15  ;;  %v1142_v14 = vcvt.f32.s32 %v1141_v51  ;;  %v1742_v10 = vld [vmem:[#allocation3 + $0x90] sm:$0xff]  ;;  %v1741_v45 = vld [vmem:[#allocation3 + $0x88] sm:$0xff] }
 0x301   : > { %1805 = vst.msk [vmem:[#allocation3 + $0x80] sm:$0xff] %vm1788_vm2, %v1772_v55  ;;  %v4358_v55 = vld [vmem:[#allocation31_spill] sm:$0xff] }
 0x302   : > { %v1630_v7 = vadd.s32 %v3843_v5, %v1161_v18  ;;  %v1145_v11 = vadd.s32 %v1144_v27, %v1142_v14  ;;  %v1413_v34 = vpop.xlane.xlu0 %1412  ;;  %v4359_v18 = vld [vmem:[#allocation28_spill] sm:$0xff] }
 0x303   : > { %v1397_v41 = vpop.xlane.xlu1 %1396  ;;  %v1414_v39 = vcvt.f32.s32 %v1413_v34  ;;  %vm4360_vm10 = vcmp.lt.f32.partialorder %v4358_v55, %v4359_v18  ;;  %v4371_v55 = vld [vmem:[#allocation37_spill] sm:$0xff] }
 0x304   : > { %v1758_v36 = vsel %vm4354_vm8, %v1630_v7, %v1726_v46  ;;  %v1629_v38 = vadd.s32 %v3843_v5, %v1145_v11  ;;  %v1398_v29 = vcvt.f32.s32 %v1397_v41  ;;  %v4361_v46 = vld [vmem:[#allocation22_spill] sm:$0xff]  ;;  %v4362_v7 = vld [vmem:[#allocation20_spill] sm:$0xff] }
 0x305   : > { %1791 = vst.msk [vmem:[#allocation3 + $0x10] sm:$0xff] %vm1788_vm2, %v1758_v36  ;;  %v1417_v37 = vadd.s32 %v1416_v2, %v1414_v39  ;;  %vm4363_vm7 = vcmp.lt.f32.partialorder %v4361_v46, %v4362_v7  ;;  %v4364_v39 = vld [vmem:[#allocation36_spill] sm:$0xff]  ;;  %v1479_v7 = vcvt.f32.s32 %v3742_v61  ;;  %v4376_v61 = vld [vmem:[#allocation46_spill] sm:$0xff] }
 0x306   : > { %v1757_v62 = vsel %vm4357_vm13, %v1629_v38, %v1725_v48  ;;  %v1401_v6 = vadd.s32 %v1400_v57, %v1398_v29  ;;  %v1189_v15 = vpop.xlane.xlu0 %1188  ;;  %v1728_v48 = vld [vmem:[#allocation3 + $0x20] sm:$0xff]  ;;  %v1223_v38 = vcvt.f32.s32 %v3732_v35  ;;  %v4365_v29 = vld [vmem:[#allocation34_spill] sm:$0xff] }
 0x307   : > { %1790 = vst.msk [vmem:[#allocation3 + $0x8] sm:$0xff] %vm1788_vm2, %v1757_v62  ;;  %v1646_v24 = vadd.s32 %v3843_v5, %v1417_v37  ;;  %v1190_v27 = vcvt.f32.s32 %v1189_v15  ;;  %vm4366_vm9 = vcmp.lt.f32.partialorder %v4364_v39, %v4365_v29  ;;  %v4377_v39 = vld [vmem:[#allocation44_spill] sm:$0xff] }
 0x308   : > { %v1645_v51 = vadd.s32 %v3843_v5, %v1401_v6  ;;  %v1207_v6 = vcvt.f32.s32 %v3736_v60  ;;  %vm4378_vm12 = vcmp.lt.f32.partialorder %v4376_v61, %v4377_v39  ;;  %v1287_v61 = vcvt.f32.s32 %v3772_v30  ;;  %v4388_v39 = vld [vmem:[#allocation55_spill] sm:$0xff] }
 0x309   : > { %v1173_v12 = vpop.xlane.xlu1 %1172  ;;  %v1774_v14 = vsel %vm4360_vm10, %v1646_v24, %v1742_v10  ;;  %v1193_v2 = vadd.s32 %v1192_v33, %v1190_v27  ;;  %v4367_v10 = vld [vmem:[#allocation32_spill] sm:$0xff]  ;;  %v1744_v33 = vld [vmem:[#allocation3 + $0xa0] sm:$0xff]  ;;  %v1224_v27 = vshll.u32 %v1223_v38, 16  ;;  %v1480_v38 = vshll.u32 %v1479_v7, 16 }
 0x30a   : > { %v1773_v11 = vsel %vm4363_vm7, %v1645_v51, %v1741_v45  ;;  %v1174_v57 = vcvt.f32.s32 %v1173_v12  ;;  %1807 = vst.msk [vmem:[#allocation3 + $0x90] sm:$0xff] %vm1788_vm2, %v1774_v14  ;;  %v1445_v41 = vpop.xlane.xlu0 %1444  ;;  %v4368_v45 = vld [vmem:[#allocation30_spill] sm:$0xff]  ;;  %v4370_v12 = vld [vmem:[#allocation40_spill] sm:$0xff]  ;;  %v1208_v46 = vshll.u32 %v1207_v6, 16  ;;  %v4379_v6 = vld [vmem:[#allocation41_spill] sm:$0xff]  ;;  %v1495_v7 = vcvt.f32.s32 %v3764_v43 }
 0x30b   : > { %1806 = vst.msk [vmem:[#allocation3 + $0x88] sm:$0xff] %vm1788_vm2, %v1773_v11  ;;  %v1632_v56 = vadd.s32 %v3843_v5, %v1193_v2  ;;  %v1446_v36 = vcvt.f32.s32 %v1445_v41  ;;  %vm4369_vm15 = vcmp.lt.f32.partialorder %v4367_v10, %v4368_v45  ;;  %vm4372_vm3 = vcmp.lt.f32.partialorder %v4370_v12, %v4371_v55  ;;  %v4380_v10 = vld [vmem:[#allocation38_spill] sm:$0xff] }
 0x30c   : > { %v1177_v34 = vadd.s32 %v1176_v53, %v1174_v57  ;;  %v1743_v53 = vld [vmem:[#allocation3 + $0x98] sm:$0xff]  ;;  %v1463_v57 = vcvt.f32.s32 %v3744_v40  ;;  %vm4381_vm0 = vcmp.lt.f32.partialorder %v4379_v6, %v4380_v10  ;;  %v1748_v6 = vld [vmem:[#allocation3 + $0xc0] sm:$0xff] }
 0x30d   : > { %v1760_v25 = vsel %vm4366_vm9, %v1632_v56, %v1728_v48  ;;  %v1429_v42 = vpop.xlane.xlu1 %1428  ;;  %v1449_v62 = vadd.s32 %v1448_v17, %v1446_v36  ;;  %v4374_v48 = vld [vmem:[#allocation33_spill] sm:$0xff] }
 0x30e   : > { %v1631_v26 = vadd.s32 %v3843_v5, %v1177_v34  ;;  %1793 = vst.msk [vmem:[#allocation3 + $0x20] sm:$0xff] %vm1788_vm2, %v1760_v25  ;;  %v1430_v37 = vcvt.f32.s32 %v1429_v42  ;;  %vm4375_vm4 = vcmp.lt.f32.partialorder %v4373_v54, %v4374_v48  ;;  %v1730_v34 = vld [vmem:[#allocation3 + $0x30] sm:$0xff]  ;;  %v1464_v42 = vshll.u32 %v1463_v57, 16  ;;  %v1732_v48 = vld [vmem:[#allocation3 + $0x40] sm:$0xff] }
 0x30f   : > { %v1648_v35 = vadd.s32 %v3843_v5, %v1449_v62 }
 0x310   : > { %v1759_v15 = vsel %vm4369_vm15, %v1631_v26, %v1727_v20  ;;  %v1433_v24 = vadd.s32 %v1432_v8, %v1430_v37  ;;  %v1221_v51 = vpop.xlane.xlu0 %1220  ;;  %v1729_v20 = vld [vmem:[#allocation3 + $0x28] sm:$0xff]  ;;  %v1255_v8 = vcvt.f32.s32 %v3752_v13  ;;  %v1239_v37 = vcvt.f32.s32 %v3754_v19 }
 0x311   : > { %1792 = vst.msk [vmem:[#allocation3 + $0x18] sm:$0xff] %vm1788_vm2, %v1759_v15  ;;  %v1222_v16 = vcvt.f32.s32 %v1221_v51  ;;  %v1776_v18 = vsel %vm4372_vm3, %v1648_v35, %v1744_v33  ;;  %v1746_v33 = vld [vmem:[#allocation3 + $0xb0] sm:$0xff]  ;;  %v1745_v51 = vld [vmem:[#allocation3 + $0xa8] sm:$0xff]  ;;  %v1511_v19 = vcvt.f32.s32 %v3762_v59 }
 0x312   : > { %v1647_v60 = vadd.s32 %v3843_v5, %v1433_v24  ;;  %v1205_v14 = vpop.xlane.xlu1 %1204  ;;  %1809 = vst.msk [vmem:[#allocation3 + $0xa0] sm:$0xff] %vm1788_vm2, %v1776_v18  ;;  %v1240_v55 = vshll.u32 %v1239_v37, 16  ;;  %v4382_v18 = vld [vmem:[#allocation48_spill] sm:$0xff] }
 0x313   : > { %v1225_v11 = vadd.s32 %v1224_v27, %v1222_v16  ;;  %v1206_v2 = vcvt.f32.s32 %v1205_v14 }
 0x314   : > { %v1775_v56 = vsel %vm4375_vm4, %v1647_v60, %v1743_v53  ;;  %v1256_v53 = vshll.u32 %v1255_v8, 16  ;;  %v4383_v60 = vld [vmem:[#allocation47_spill] sm:$0xff]  ;;  %v4392_v8 = vld [vmem:[#allocation49_spill] sm:$0xff] }
 0x315   : > { %1808 = vst.msk [vmem:[#allocation3 + $0x98] sm:$0xff] %vm1788_vm2, %v1775_v56  ;;  %v1634_v41 = vadd.s32 %v3843_v5, %v1225_v11  ;;  %v1209_v17 = vadd.s32 %v1208_v46, %v1206_v2  ;;  %v1477_v36 = vpop.xlane.xlu0 %1476  ;;  %vm4384_vm11 = vcmp.lt.f32.partialorder %v4382_v18, %v4383_v60  ;;  %v4385_v11 = vld [vmem:[#allocation45_spill] sm:$0xff]  ;;  %v4386_v2 = vld [vmem:[#allocation43_spill] sm:$0xff]  ;;  %v4398_v18 = vld [vmem:[#allocation52_spill] sm:$0xff] }
 0x316   : > { %v1478_v40 = vcvt.f32.s32 %v1477_v36  ;;  %v1461_v26 = vpop.xlane.xlu1 %1460  ;;  %vm4387_vm5 = vcmp.lt.f32.partialorder %v4385_v11, %v4386_v2  ;;  %v1733_v11 = vld [vmem:[#allocation3 + $0x48] sm:$0xff] }
 0x317   : > { %v1762_v29 = vsel %vm4378_vm12, %v1634_v41, %v1730_v34  ;;  %v1633_v25 = vadd.s32 %v3843_v5, %v1209_v17  ;;  %v1462_v62 = vcvt.f32.s32 %v1461_v26  ;;  %v1731_v34 = vld [vmem:[#allocation3 + $0x38] sm:$0xff]  ;;  %v1512_v17 = vshll.u32 %v1511_v19, 16  ;;  %v4397_v19 = vld [vmem:[#allocation53_spill] sm:$0xff] }
 0x318   : > { %1795 = vst.msk [vmem:[#allocation3 + $0x30] sm:$0xff] %vm1788_vm2, %v1762_v29  ;;  %v1481_v15 = vadd.s32 %v1480_v38, %v1478_v40  ;;  %v1496_v38 = vshll.u32 %v1495_v7, 16  ;;  %v4389_v29 = vld [vmem:[#allocation54_spill] sm:$0xff]  ;;  %v1271_v26 = vcvt.f32.s32 %v3774_v4  ;;  %vm4399_vm8 = vcmp.lt.f32.partialorder %v4397_v19, %v4398_v18 }
 0x319   : > { %v1761_v45 = vsel %vm4381_vm0, %v1633_v25, %v1729_v20  ;;  %v1465_v35 = vadd.s32 %v1464_v42, %v1462_v62  ;;  %vm4390_vm6 = vcmp.lt.f32.partialorder %v4388_v39, %v4389_v29  ;;  %v4391_v42 = vld [vmem:[#allocation50_spill] sm:$0xff]  ;;  %v1750_v29 = vld [vmem:[#allocation3 + $0xd0] sm:$0xff] }
 0x31a   : > { %1794 = vst.msk [vmem:[#allocation3 + $0x28] sm:$0xff] %vm1788_vm2, %v1761_v45  ;;  %v1650_v24 = vadd.s32 %v3843_v5, %v1481_v15  ;;  %vm4393_vm1 = vcmp.lt.f32.partialorder %v4391_v42, %v4392_v8  ;;  %v1747_v45 = vld [vmem:[#allocation3 + $0xb8] sm:$0xff] }
 0x31b   : > { %v1253_v27 = vpop.xlane.xlu0 %1252  ;;  %v1649_v13 = vadd.s32 %v3843_v5, %v1465_v35  ;;  %v1237_v12 = vpop.xlane.xlu1 %1236 }
 0x31c   : > { %v1254_v16 = vcvt.f32.s32 %v1253_v27  ;;  %v1778_v14 = vsel %vm4384_vm11, %v1650_v24, %v1746_v33  ;;  %v1238_v46 = vcvt.f32.s32 %v1237_v12  ;;  %v1288_v33 = vshll.u32 %v1287_v61, 16 }
 0x31d   : > { %1811 = vst.msk [vmem:[#allocation3 + $0xb0] sm:$0xff] %vm1788_vm2, %v1778_v14  ;;  %v1777_v57 = vsel %vm4387_vm5, %v1649_v13, %v1745_v51  ;;  %v1272_v51 = vshll.u32 %v1271_v26, 16  ;;  %v1543_v27 = vcvt.f32.s32 %v3782_v47  ;;  %v4395_v13 = vld [vmem:[#allocation56_spill] sm:$0xff] }
 0x31e   : > { %v1257_v54 = vadd.s32 %v1256_v53, %v1254_v16  ;;  %1810 = vst.msk [vmem:[#allocation3 + $0xa8] sm:$0xff] %vm1788_vm2, %v1777_v57  ;;  %v1241_v56 = vadd.s32 %v1240_v55, %v1238_v46  ;;  %v4394_v53 = vld [vmem:[#allocation57_spill] sm:$0xff]  ;;  %v1527_v55 = vcvt.f32.s32 %v3784_v3  ;;  %v1734_v46 = vld [vmem:[#allocation3 + $0x50] sm:$0xff] }
 0x31f   : > { %v1509_v41 = vpop.xlane.xlu0 %1508  ;;  %v1493_v43 = vpop.xlane.xlu1 %1492  ;;  %vm4396_vm14 = vcmp.lt.f32.partialorder %v4394_v53, %v4395_v13  ;;  %v1544_v57 = vshll.u32 %v1543_v27, 16  ;;  %v1736_v27 = vld [vmem:[#allocation3 + $0x60] sm:$0xff]  ;;  %v1735_v13 = vld [vmem:[#allocation3 + $0x58] sm:$0xff] }
 0x320   : > { %v1636_v59 = vadd.s32 %v3843_v5, %v1257_v54  ;;  %v1635_v20 = vadd.s32 %v3843_v5, %v1241_v56  ;;  %v1510_v36 = vcvt.f32.s32 %v1509_v41  ;;  %v1494_v40 = vcvt.f32.s32 %v1493_v43  ;;  %v4401_v41 = vld [vmem:[#allocation63_spill] sm:$0xff] }
 0x321   : > { %v1528_v56 = vshll.u32 %v1527_v55, 16  ;;  %v4403_v43 = vld [vmem:[#allocation59_spill] sm:$0xff]  ;;  %v1351_v55 = vcvt.f32.s32 %v3812_v50  ;;  %v1752_v50 = vld [vmem:[#allocation3 + $0xe0] sm:$0xff] }
 0x322   : > { %v1764_v25 = vsel %vm4390_vm6, %v1636_v59, %v1732_v48  ;;  %v1763_v62 = vsel %vm4393_vm1, %v1635_v20, %v1731_v34  ;;  %v1513_v37 = vadd.s32 %v1512_v17, %v1510_v36  ;;  %v1497_v10 = vadd.s32 %v1496_v38, %v1494_v40  ;;  %v4400_v34 = vld [vmem:[#allocation62_spill] sm:$0xff] }
 0x323   : > { %1797 = vst.msk [vmem:[#allocation3 + $0x40] sm:$0xff] %vm1788_vm2, %v1764_v25  ;;  %1796 = vst.msk [vmem:[#allocation3 + $0x38] sm:$0xff] %vm1788_vm2, %v1763_v62  ;;  %v1285_v15 = vpop.xlane.xlu0 %1284  ;;  %v1319_v59 = vcvt.f32.s32 %v3792_v1  ;;  %vm4402_vm13 = vcmp.lt.f32.partialorder %v4400_v34, %v4401_v41  ;;  %v1303_v36 = vcvt.f32.s32 %v3794_v28  ;;  %v4404_v38 = vld [vmem:[#allocation58_spill] sm:$0xff]  ;;  %v1751_v41 = vld [vmem:[#allocation3 + $0xd8] sm:$0xff] }
 0x324   : > { %v1652_v30 = vadd.s32 %v3843_v5, %v1513_v37  ;;  %v1651_v35 = vadd.s32 %v3843_v5, %v1497_v10  ;;  %v1286_v24 = vcvt.f32.s32 %v1285_v15  ;;  %vm4405_vm10 = vcmp.lt.f32.partialorder %v4403_v43, %v4404_v38  ;;  %v1749_v40 = vld [vmem:[#allocation3 + $0xc8] sm:$0xff] }
 0x325   : > { %v1269_v4 = vpop.xlane.xlu1 %1268  ;;  %v1320_v42 = vshll.u32 %v1319_v59, 16  ;;  %v1304_v37 = vshll.u32 %v1303_v36, 16  ;;  %v4406_v10 = vld [vmem:[#allocation66_spill] sm:$0xff]  ;;  %v1352_v59 = vshll.u32 %v1351_v55, 16  ;;  %v1591_v43 = vcvt.f32.s32 %v3824_v31  ;;  %v4428_v55 = vld [vmem:[#allocation7_spill] sm:$0xff] }
 0x326   : > { %v1780_v16 = vsel %vm4396_vm14, %v1652_v30, %v1748_v6  ;;  %v1270_v12 = vcvt.f32.s32 %v1269_v4  ;;  %v1779_v60 = vsel %vm4399_vm8, %v1651_v35, %v1747_v45  ;;  %v1289_v14 = vadd.s32 %v1288_v33, %v1286_v24  ;;  %v4407_v30 = vld [vmem:[#allocation65_spill] sm:$0xff]  ;;  %v4410_v24 = vld [vmem:[#allocation60_spill] sm:$0xff] }
 0x327   : > { %1813 = vst.msk [vmem:[#allocation3 + $0xc0] sm:$0xff] %vm1788_vm2, %v1780_v16  ;;  %1812 = vst.msk [vmem:[#allocation3 + $0xb8] sm:$0xff] %vm1788_vm2, %v1779_v60  ;;  %v1575_v6 = vcvt.f32.s32 %v3802_v32  ;;  %vm4408_vm7 = vcmp.lt.f32.partialorder %v4406_v10, %v4407_v30  ;;  %v1559_v33 = vcvt.f32.s32 %v3805_v44  ;;  %v4409_v35 = vld [vmem:[#allocation61_spill] sm:$0xff] }
 0x328   : > { %v1273_v7 = vadd.s32 %v1272_v51, %v1270_v12  ;;  %v1638_v47 = vadd.s32 %v3843_v5, %v1289_v14  ;;  %v1541_v2 = vpop.xlane.xlu0 %1540  ;;  %vm4411_vm9 = vcmp.lt.f32.partialorder %v4409_v35, %v4410_v24  ;;  %v1335_v14 = vcvt.f32.s32 %v3815_v52  ;;  %v1754_v24 = vld [vmem:[#allocation3 + $0xf0] sm:$0xff] }
 0x329   : > { %v1542_v48 = vcvt.f32.s32 %v1541_v2  ;;  %v1576_v12 = vshll.u32 %v1575_v6, 16  ;;  %v1560_v60 = vshll.u32 %v1559_v33, 16  ;;  %v4415_v2 = vld [vmem:[#allocation67_spill] sm:$0xff]  ;;  %v1607_v52 = vcvt.f32.s32 %v3822_v63  ;;  %v4420_v63 = vld [vmem:[#allocation70_spill] sm:$0xff]  ;;  %v4424_v33 = vld [vmem:[#allocation77_spill] sm:$0xff] }
 0x32a   : > { %v1637_v54 = vadd.s32 %v3843_v5, %v1273_v7  ;;  %v1525_v3 = vpop.xlane.xlu1 %1524  ;;  %v1766_v17 = vsel %vm4402_vm13, %v1638_v47, %v1734_v46  ;;  %v4412_v46 = vld [vmem:[#allocation69_spill] sm:$0xff]  ;;  %v1336_v36 = vshll.u32 %v1335_v14, 16  ;;  %vm4421_vm12 = vcmp.lt.f32.partialorder %v3314_v23, %v4420_v63  ;;  %v4422_v23 = vld [vmem:[#allocation12_spill] sm:$0xff] }
 0x32b   : > { %v1526_v20 = vcvt.f32.s32 %v1525_v3  ;;  %1799 = vst.msk [vmem:[#allocation3 + $0x50] sm:$0xff] %vm1788_vm2, %v1766_v17  ;;  %v1545_v39 = vadd.s32 %v1544_v57, %v1542_v48  ;;  %v4413_v7 = vld [vmem:[#allocation73_spill] sm:$0xff]  ;;  %v4416_v57 = vld [vmem:[#allocation68_spill] sm:$0xff]  ;;  %v1367_v6 = vcvt.f32.s32 %v3831_v21  ;;  %vm4423_vm0 = vcmp.lt.f32.partialorder %v3426_v49, %v4422_v23 }
 0x32c   : > { %v1765_v61 = vsel %vm4405_vm10, %v1637_v54, %v1733_v11  ;;  %vm4414_vm15 = vcmp.lt.f32.partialorder %v4412_v46, %v4413_v7  ;;  %vm4417_vm3 = vcmp.lt.f32.partialorder %v4415_v2, %v4416_v57  ;;  %vm4425_vm11 = vcmp.lt.f32.partialorder %v3364_v22, %v4424_v33  ;;  %v4427_v22 = vld [vmem:[#allocation78_spill] sm:$0xff]  ;;  %v4431_v7 = vld [vmem:[#allocation15_spill] sm:$0xff]  ;;  %v1755_v2 = vld [vmem:[#allocation3 + $0xf8] sm:$0xff] }
 0x32d   : > { %1798 = vst.msk [vmem:[#allocation3 + $0x48] sm:$0xff] %vm1788_vm2, %v1765_v61  ;;  %v1529_v25 = vadd.s32 %v1528_v56, %v1526_v20  ;;  %v1654_v1 = vadd.s32 %v3843_v5, %v1545_v39  ;;  %v4418_v39 = vld [vmem:[#allocation5_spill] sm:$0xff]  ;;  %v1368_v49 = vshll.u32 %v1367_v6, 16  ;;  %vm4429_vm6 = vcmp.lt.f32.partialorder %v4427_v22, %v4428_v55 }
 0x32e   : > { %v1317_v26 = vpop.xlane.xlu0 %1316  ;;  %vm4419_vm4 = vcmp.lt.f32.partialorder %v3362_v58, %v4418_v39  ;;  %v1592_v58 = vshll.u32 %v1591_v43, 16  ;;  %v1937_v63 = vld [vmem:[#allocation3 + $0x80] sm:$0xff] (!%p2128_p13) }
 0x32f   : > { %v1653_v8 = vadd.s32 %v3843_v5, %v1529_v25  ;;  %v1318_v62 = vcvt.f32.s32 %v1317_v26  ;;  %v1301_v28 = vpop.xlane.xlu1 %1300  ;;  %v1782_v45 = vsel %vm4408_vm7, %v1654_v1, %v1750_v29  ;;  %1969 = vst.msk [vmem:[%s2382_s24 + $0x80] sm:$0xff] (!%p2128_p13), %vm1788_vm2, %v1937_v63 }
 0x330   : > { %v1302_v15 = vcvt.f32.s32 %v1301_v28  ;;  %1815 = vst.msk [vmem:[#allocation3 + $0xd0] sm:$0xff] %vm1788_vm2, %v1782_v45 }
 0x331   : > { %v1781_v4 = vsel %vm4411_vm9, %v1653_v8, %v1749_v40  ;;  %v1321_v51 = vadd.s32 %v1320_v42, %v1318_v62  ;;  %v1738_v40 = vld [vmem:[#allocation3 + $0x70] sm:$0xff]  ;;  %v1608_v8 = vshll.u32 %v1607_v52, 16  ;;  %v1737_v62 = vld [vmem:[#allocation3 + $0x68] sm:$0xff]  ;;  %v1925_v52 = vld [vmem:[#allocation3 + $0x20] sm:$0xff] (!%p2128_p13) }
 0x332   : > { %1814 = vst.msk [vmem:[#allocation3 + $0xc8] sm:$0xff] %vm1788_vm2, %v1781_v4  ;;  %v1305_v53 = vadd.s32 %v1304_v37, %v1302_v15  ;;  %v1573_v16 = vpop.xlane.xlu0 %1572  ;;  %1957 = vst.msk [vmem:[%s2382_s24 + $0x20] sm:$0xff] (!%p2128_p13), %vm1788_vm2, %v1925_v52  ;;  %v1931_v43 = vld [vmem:[#allocation3 + $0x50] sm:$0xff] (!%p2128_p13) }
 0x333   : > { %v1640_v32 = vadd.s32 %v3843_v5, %v1321_v51  ;;  %v1574_v19 = vcvt.f32.s32 %v1573_v16  ;;  %v4426_v51 = vld [vmem:[#allocation16_spill] sm:$0xff]  ;;  %1963 = vst.msk [vmem:[%s2382_s24 + $0x50] sm:$0xff] (!%p2128_p13), %vm1788_vm2, %v1931_v43 }
 0x334   : > { %v1639_v44 = vadd.s32 %v3843_v5, %v1305_v53  ;;  %v1557_v18 = vpop.xlane.xlu1 %1556  ;;  %vm1722_vm5 = vcmp.lt.f32.partialorder %v3491_v9, %v4426_v51 }
 0x335   : > { %v1768_v47 = vsel %vm4414_vm15, %v1640_v32, %v1736_v27  ;;  %v1558_v11 = vcvt.f32.s32 %v1557_v18  ;;  %v1577_v48 = vadd.s32 %v1576_v12, %v1574_v19  ;;  %v1753_v27 = vld [vmem:[#allocation3 + $0xe8] sm:$0xff]  ;;  %v1623_v32 = vcvt.f32.s32 %v3836_v0  ;;  %v1739_v19 = vld [vmem:[#allocation3 + $0x78] sm:$0xff] }
 0x336   : > { %1801 = vst.msk [vmem:[#allocation3 + $0x60] sm:$0xff] %vm1788_vm2, %v1768_v47  ;;  %v1767_v54 = vsel %vm4417_vm3, %v1639_v44, %v1735_v13  ;;  %v1349_v56 = vpop.xlane.xlu0 %1348  ;;  %v4430_v0 = vld [vmem:[#allocation14_spill] sm:$0xff] }
 0x337   : > { %1800 = vst.msk [vmem:[#allocation3 + $0x58] sm:$0xff] %vm1788_vm2, %v1767_v54  ;;  %v1561_v3 = vadd.s32 %v1560_v60, %v1558_v11  ;;  %v1656_v34 = vadd.s32 %v3843_v5, %v1577_v48  ;;  %v1350_v17 = vcvt.f32.s32 %v1349_v56  ;;  %v1624_v60 = vshll.u32 %v1623_v32, 16  ;;  %v4433_v54 = vld [vmem:[#allocation80_spill] sm:$0xff]  ;;  %v4434_v48 = vld [vmem:[#allocation79_spill] sm:$0xff]  ;;  %v1922_v56 = vld [vmem:[#allocation3 + $0x8] sm:$0xff] (!%p2128_p13) }
 0x338   : > { %v1333_v20 = vpop.xlane.xlu1 %1332  ;;  %vm4432_vm1 = vcmp.lt.f32.partialorder %v4430_v0, %v4431_v7  ;;  %vm1723_vm14 = vcmp.lt.f32.partialorder %v4434_v48, %v4433_v54  ;;  %1954 = vst.msk [vmem:[%s2382_s24 + $0x8] sm:$0xff] (!%p2128_p13), %vm1788_vm2, %v1922_v56 }
 0x339   : > { %v1655_v38 = vadd.s32 %v3843_v5, %v1561_v3  ;;  %v1334_v61 = vcvt.f32.s32 %v1333_v20  ;;  %v1784_v29 = vsel %vm4419_vm4, %v1656_v34, %v1752_v50  ;;  %v1353_v25 = vadd.s32 %v1352_v59, %v1350_v17  ;;  %v1921_v3 = vld [vmem:[#allocation3] sm:$0xff] (!%p2128_p13)  ;;  %v1924_v59 = vld [vmem:[#allocation3 + $0x18] sm:$0xff] (!%p2128_p13)  ;;  %v1926_v34 = vld [vmem:[#allocation3 + $0x28] sm:$0xff] (!%p2128_p13) }
 0x33a   : > { %1817 = vst.msk [vmem:[#allocation3 + $0xe0] sm:$0xff] %vm1788_vm2, %v1784_v29  ;;  %v1605_v42 = vpop.xlane.xlu0 %1604  ;;  %1953 = vst.msk [vmem:[%s2382_s24] sm:$0xff] (!%p2128_p13), %vm1788_vm2, %v1921_v3  ;;  %v1928_v17 = vld [vmem:[#allocation3 + $0x38] sm:$0xff] (!%p2128_p13)  ;;  %v1929_v20 = vld [vmem:[#allocation3 + $0x40] sm:$0xff] (!%p2128_p13) }
 0x33b   : > { %v1783_v1 = vsel %vm4421_vm12, %v1655_v38, %v1751_v41  ;;  %v1337_v26 = vadd.s32 %v1336_v36, %v1334_v61  ;;  %v1642_v31 = vadd.s32 %v3843_v5, %v1353_v25  ;;  %v1606_v28 = vcvt.f32.s32 %v1605_v42  ;;  %1956 = vst.msk [vmem:[%s2382_s24 + $0x18] sm:$0xff] (!%p2128_p13), %vm1788_vm2, %v1924_v59  ;;  %1958 = vst.msk [vmem:[%s2382_s24 + $0x28] sm:$0xff] (!%p2128_p13), %vm1788_vm2, %v1926_v34  ;;  %v1927_v41 = vld [vmem:[#allocation3 + $0x30] sm:$0xff] (!%p2128_p13)  ;;  %v1930_v36 = vld [vmem:[#allocation3 + $0x48] sm:$0xff] (!%p2128_p13) }
 0x33c   : > { %1816 = vst.msk [vmem:[#allocation3 + $0xd8] sm:$0xff] %vm1788_vm2, %v1783_v1  ;;  %v1589_v37 = vpop.xlane.xlu1 %1588  ;;  %1959 = vst.msk [vmem:[%s2382_s24 + $0x30] sm:$0xff] (!%p2128_p13), %vm1788_vm2, %v1927_v41  ;;  %v1938_v1 = vld [vmem:[#allocation3 + $0x88] sm:$0xff] (!%p2128_p13)  ;;  %v1941_v42 = vld [vmem:[#allocation3 + $0xa0] sm:$0xff] (!%p2128_p13) }
 0x33d   : > { %v1641_v10 = vadd.s32 %v3843_v5, %v1337_v26  ;;  %v1590_v30 = vcvt.f32.s32 %v1589_v37  ;;  %v1770_v45 = vsel %vm4423_vm0, %v1642_v31, %v1738_v40  ;;  %v1609_v15 = vadd.s32 %v1608_v8, %v1606_v28  ;;  %1960 = vst.msk [vmem:[%s2382_s24 + $0x38] sm:$0xff] (!%p2128_p13), %vm1788_vm2, %v1928_v17  ;;  %1961 = vst.msk [vmem:[%s2382_s24 + $0x40] sm:$0xff] (!%p2128_p13), %vm1788_vm2, %v1929_v20  ;;  %v1933_v61 = vld [vmem:[#allocation3 + $0x60] sm:$0xff] (!%p2128_p13)  ;;  %v1939_v40 = vld [vmem:[#allocation3 + $0x90] sm:$0xff] (!%p2128_p13) }
 0x33e   : > { %1803 = vst.msk [vmem:[#allocation3 + $0x70] sm:$0xff] %vm1788_vm2, %v1770_v45  ;;  %v1932_v38 = vld [vmem:[#allocation3 + $0x58] sm:$0xff] (!%p2128_p13)  ;;  %1962 = vst.msk [vmem:[%s2382_s24 + $0x48] sm:$0xff] (!%p2128_p13), %vm1788_vm2, %v1930_v36  ;;  %v1942_v8 = vld [vmem:[#allocation3 + $0xa8] sm:$0xff] (!%p2128_p13) }
 0x33f   : > { %v1769_v35 = vsel %vm4425_vm11, %v1641_v10, %v1737_v62  ;;  %v1593_v4 = vadd.s32 %v1592_v58, %v1590_v30  ;;  %v1658_v21 = vadd.s32 %v3843_v5, %v1609_v15  ;;  %1964 = vst.msk [vmem:[%s2382_s24 + $0x58] sm:$0xff] (!%p2128_p13), %vm1788_vm2, %v1932_v38  ;;  %1965 = vst.msk [vmem:[%s2382_s24 + $0x60] sm:$0xff] (!%p2128_p13), %vm1788_vm2, %v1933_v61  ;;  %v1940_v26 = vld [vmem:[#allocation3 + $0x98] sm:$0xff] (!%p2128_p13)  ;;  %v1943_v31 = vld [vmem:[#allocation3 + $0xb0] sm:$0xff] (!%p2128_p13) }
 0x340   : > { %1802 = vst.msk [vmem:[#allocation3 + $0x68] sm:$0xff] %vm1788_vm2, %v1769_v35  ;;  %v1365_v53 = vpop.xlane.xlu1 %1364  ;;  %1970 = vst.msk [vmem:[%s2382_s24 + $0x88] sm:$0xff] (!%p2128_p13), %vm1788_vm2, %v1938_v1  ;;  %v1944_v62 = vld [vmem:[#allocation3 + $0xb8] sm:$0xff] (!%p2128_p13)  ;;  %v1945_v28 = vld [vmem:[#allocation3 + $0xc0] sm:$0xff] (!%p2128_p13) }
 0x341   : > { %v1657_v13 = vadd.s32 %v3843_v5, %v1593_v4  ;;  %v1366_v16 = vcvt.f32.s32 %v1365_v53  ;;  %v1786_v12 = vsel %vm1722_vm5, %v1658_v21, %v1754_v24  ;;  %1971 = vst.msk [vmem:[%s2382_s24 + $0x90] sm:$0xff] (!%p2128_p13), %vm1788_vm2, %v1939_v40  ;;  %1972 = vst.msk [vmem:[%s2382_s24 + $0x98] sm:$0xff] (!%p2128_p13), %vm1788_vm2, %v1940_v26  ;;  %v1946_v37 = vld [vmem:[#allocation3 + $0xc8] sm:$0xff] (!%p2128_p13)  ;;  %v1947_v58 = vld [vmem:[#allocation3 + $0xd0] sm:$0xff] (!%p2128_p13) }
 0x342   : > { %1819 = vst.msk [vmem:[#allocation3 + $0xf0] sm:$0xff] %vm1788_vm2, %v1786_v12  ;;  %1973 = vst.msk [vmem:[%s2382_s24 + $0xa0] sm:$0xff] (!%p2128_p13), %vm1788_vm2, %v1941_v42  ;;  %v1949_v10 = vld [vmem:[#allocation3 + $0xe0] sm:$0xff] (!%p2128_p13) }
 0x343   : > { %v1785_v44 = vsel %vm4429_vm6, %v1657_v13, %v1753_v27  ;;  %v1369_v9 = vadd.s32 %v1368_v49, %v1366_v16  ;;  %1974 = vst.msk [vmem:[%s2382_s24 + $0xa8] sm:$0xff] (!%p2128_p13), %vm1788_vm2, %v1942_v8  ;;  %1975 = vst.msk [vmem:[%s2382_s24 + $0xb0] sm:$0xff] (!%p2128_p13), %vm1788_vm2, %v1943_v31  ;;  %v1948_v6 = vld [vmem:[#allocation3 + $0xd8] sm:$0xff] (!%p2128_p13) }
 0x344   : > { %1818 = vst.msk [vmem:[#allocation3 + $0xe8] sm:$0xff] %vm1788_vm2, %v1785_v44  ;;  %v1621_v18 = vpop.xlane.xlu1 %1620  ;;  %1976 = vst.msk [vmem:[%s2382_s24 + $0xb8] sm:$0xff] (!%p2128_p13), %vm1788_vm2, %v1944_v62 }
 0x345   : > { %v1643_v14 = vadd.s32 %v3843_v5, %v1369_v9  ;;  %v1622_v46 = vcvt.f32.s32 %v1621_v18  ;;  %v1935_v29 = vld [vmem:[#allocation3 + $0x70] sm:$0xff] (!%p2128_p13)  ;;  %1977 = vst.msk [vmem:[%s2382_s24 + $0xc0] sm:$0xff] (!%p2128_p13), %vm1788_vm2, %v1945_v28  ;;  %1978 = vst.msk [vmem:[%s2382_s24 + $0xc8] sm:$0xff] (!%p2128_p13), %vm1788_vm2, %v1946_v37 }
 0x346   : > { %1920 = sbr.rel (%p2128_p13) target bundleno = 853 (0x355), region = 63  ;;  %1967 = vst.msk [vmem:[%s2382_s24 + $0x70] sm:$0xff] (!%p2128_p13), %vm1788_vm2, %v1935_v29  ;;  %1979 = vst.msk [vmem:[%s2382_s24 + $0xd0] sm:$0xff] (!%p2128_p13), %vm1788_vm2, %v1947_v58 }
 0x347   : > { %v1771_v47 = vsel %vm4432_vm1, %v1643_v14, %v1739_v19  ;;  %v1625_v11 = vadd.s32 %v1624_v60, %v1622_v46  ;;  %v1934_v39 = vld [vmem:[#allocation3 + $0x68] sm:$0xff] (!%p2128_p13)  ;;  %1980 = vst.msk [vmem:[%s2382_s24 + $0xd8] sm:$0xff] (!%p2128_p13), %vm1788_vm2, %v1948_v6  ;;  %1981 = vst.msk [vmem:[%s2382_s24 + $0xe0] sm:$0xff] (!%p2128_p13), %vm1788_vm2, %v1949_v10 }
 0x348   : > { %1804 = vst.msk [vmem:[#allocation3 + $0x78] sm:$0xff] %vm1788_vm2, %v1771_v47  ;;  %1966 = vst.msk [vmem:[%s2382_s24 + $0x68] sm:$0xff] (!%p2128_p13), %vm1788_vm2, %v1934_v39 }
 0x349   : > { %v1659_v57 = vadd.s32 %v3843_v5, %v1625_v11  ;;  %v1923_v5 = vld [vmem:[#allocation3 + $0x10] sm:$0xff] (!%p2128_p13) }
 0x34a   : > { %1955 = vst.msk [vmem:[%s2382_s24 + $0x10] sm:$0xff] (!%p2128_p13), %vm1788_vm2, %v1923_v5  ;;  %v1951_v23 = vld [vmem:[#allocation3 + $0xf0] sm:$0xff] (!%p2128_p13) }
 0x34b   : > { %v1787_v50 = vsel %vm1723_vm14, %v1659_v57, %v1755_v2  ;;  %v1950_v30 = vld [vmem:[#allocation3 + $0xe8] sm:$0xff] (!%p2128_p13)  ;;  %1983 = vst.msk [vmem:[%s2382_s24 + $0xf0] sm:$0xff] (!%p2128_p13), %vm1788_vm2, %v1951_v23 }
 0x34c   : > { %1820 = vst.msk [vmem:[#allocation3 + $0xf8] sm:$0xff] %vm1788_vm2, %v1787_v50  ;;  %1982 = vst.msk [vmem:[%s2382_s24 + $0xe8] sm:$0xff] (!%p2128_p13), %vm1788_vm2, %v1950_v30 }
 0x34f   : > { %v1936_v25 = vld [vmem:[#allocation3 + $0x78] sm:$0xff] }
 0x350   : > { %1968 = vst.msk [vmem:[%s2382_s24 + $0x78] sm:$0xff] %vm1788_vm2, %v1936_v25 }
 0x353   : > { %v1952_v45 = vld [vmem:[#allocation3 + $0xf8] sm:$0xff] }
 0x354   : > { %1984 = vst.msk [vmem:[%s2382_s24 + $0xf8] sm:$0xff] %vm1788_vm2, %v1952_v45 }
 0x355 PF: > { %s13_s18 = sadd.s32 1, %s2269_s18   ;;  %s4435_s12 = smov %s2249_s13 }
 0x356   : > { %p10_p0 = scmp.ge.s32.totalorder %s13_s18, 6   ;;  %s4436_s13 = smov %s2343_s23 }
 0x357   : > { %s4437_s14 = smov %s2261_s16  ;;  %s4438_s15 = smov %s2265_s17 }
 0x358   : > { %s4439_s16 = smov %s4442_s19  ;;  %s4440_s17 = smov %s4446_s20 }
 0x359   :  { %12 = sbr.rel (!%p10_p0) target bundleno = 4 (0x4), region = 104 }

</bundles_post_ra>
